<compile_context>
chip_gen: v7x
topology: tpu7x:2x2x1
jax: 0.10.0
libtpu: 0.0.40
codegen_flags: <defaults>
</compile_context>

<pallas_src>
import jax
import jax.numpy as jnp
from jax.experimental import pallas as pl
from jax.experimental.pallas import tpu as pltpu

EPS = 1e-5
MATMUL_DTYPE = jnp.bfloat16
SPP_GRIDS = (8, 4, 2, 1)


# ---------------------------------------------------------------------------
# BatchNorm folding (training-mode batch stats, biased variance)
# ---------------------------------------------------------------------------
def _bn_fold(mean, var, gamma, beta, eps=EPS):
    inv = gamma * jax.lax.rsqrt(var + eps)
    return inv.astype(jnp.float32), (beta - mean * inv).astype(jnp.float32)


def _bn_stats_dense(x_flat):
    """Per-channel (mean, biased var) over (N, spatial) of a (N, C, S) tensor.

    Single HBM pass; the second moment is taken about a cheap per-channel
    shift so m2 - m1^2 does not catastrophically cancel for large-mean data.
    """
    x32 = x_flat.astype(jnp.float32)
    c = x32[:1, :, :1]                       # (1, C, 1) per-channel shift
    d = x32 - c
    m1 = jnp.mean(d, axis=(0, 2))
    m2 = jnp.mean(d * d, axis=(0, 2))
    var = jnp.maximum(m2 - m1 * m1, 0.0)
    return m1 + c[0, :, 0], var


def _bn_stats_upsampled(level, Uh, Uw):
    """Exact (mean, biased var) of the bilinear-upsampled level WITHOUT
    materializing it.

    level: (N, C, gh, gw)   Uh: (H, gh)   Uw: (W, gw)
    x_up[n,c,h,w] = sum_ij Uh[h,i] Uw[w,j] level[n,c,i,j]; its spatial moments
    reduce to weighted sums / quadratic forms on the tiny level tensor.
    """
    H, W = Uh.shape[0], Uw.shape[0]
    lvl = level.astype(jnp.float32)
    ch = jnp.sum(Uh, axis=0) / H             # (gh,)
    cw = jnp.sum(Uw, axis=0) / W             # (gw,)
    Gh = (Uh.T @ Uh) / H                     # (gh, gh)
    Gw = (Uw.T @ Uw) / W                     # (gw, gw)
    mean_nc = jnp.einsum('ncij,i,j->nc', lvl, ch, cw)
    m2_nc = jnp.einsum('ncij,ik,jl,nckl->nc', lvl, Gh, Gw, lvl)
    mean = jnp.mean(mean_nc, axis=0)
    var = jnp.maximum(jnp.mean(m2_nc, axis=0) - mean * mean, 0.0)
    return mean, var


# ---------------------------------------------------------------------------
# Pallas kernel: fused [BN->ReLU per channel block] -> single wide 1x1 conv
# ---------------------------------------------------------------------------
def _make_fused_kernel(kinds):
    """kinds: tuple of 'x' / 'up' tags, one per channel block (weight order).

    'x'  refs: x (1, C_j, ts), scale (C_j,1), shift (C_j,1)
    'up' refs: level (1, C_j, ghw), U (ghw, ts), scale (C_j,1), shift (C_j,1)
    trailing:  W (C_out, sum C_j) bf16, bias (C_out,1) f32, out (1, C_out, ts)
    """
    def kernel(*refs):
        w_ref, b_ref, o_ref = refs[-3], refs[-2], refs[-1]
        hs, idx = [], 0
        for kind in kinds:
            if kind == 'x':
                x_ref, s_ref, t_ref = refs[idx:idx + 3]
                idx += 3
                xv = x_ref[0].astype(jnp.float32)                    # (C_j, ts)
            else:  # 'up': in-kernel bilinear upsample of the tiny level
                l_ref, u_ref, s_ref, t_ref = refs[idx:idx + 4]
                idx += 4
                lv = l_ref[0]                                         # (C_j, ghw)
                ghw = lv.shape[1]
                if ghw < 8:        # tiny contraction: VPU broadcast-MACs
                    lv32 = lv.astype(jnp.float32)
                    u32 = u_ref[...].astype(jnp.float32)              # (ghw, ts)
                    xv = lv32[:, 0:1] * u32[0:1, :]
                    for k in range(1, ghw):
                        xv = xv + lv32[:, k:k + 1] * u32[k:k + 1, :]
                else:
                    xv = jnp.dot(lv, u_ref[...],
                                 preferred_element_type=jnp.float32)
            h = jnp.maximum(xv * s_ref[...] + t_ref[...], 0.0)        # f32 affine+ReLU
            hs.append(h.astype(MATMUL_DTYPE))
        h_all = hs[0] if len(hs) == 1 else jnp.concatenate(hs, axis=0)
        out = jnp.dot(w_ref[...], h_all,
                      preferred_element_type=jnp.float32) + b_ref[...]
        o_ref[0] = out.astype(o_ref.dtype)
    return kernel


def _spatial_tile(hw, n_batch):
    """Largest lane-dense spatial tile that still yields >=4 total grid steps
    (>=2 per v7x TensorCore) so the BlockSpec pipeliner can prefetch."""
    hw128 = -(-hw // 128) * 128
    cands = [c for c in (1024, 512, 256, 128) if c <= hw128]
    if hw128 < 1024 and hw128 not in cands:
        cands.insert(0, hw128)
    if not cands:
        cands = [128]
    for ts in cands:
        if n_batch * (-(-hw // ts)) >= 4:
            return ts
    return cands[0]                  # tiny problem: fewest / largest steps


def _vmem_limit(working_set_bytes):
    cap = None
    try:
        cap = getattr(pltpu.get_tpu_info(), "vmem_capacity_bytes", None)
    except Exception:
        cap = None
    if not cap:
        cap = 64 << 20               # assume v7x-sized VMEM if unknown
    limit = max(2 * int(working_set_bytes) + (4 << 20), 32 << 20)
    return int(min(limit, int(0.75 * cap), 96 << 20))


def fused_bn_relu_conv1x1(blocks, weight, bias, n, hw, out_dtype):
    """Fused BN(train stats)->ReLU->Conv2d(1x1) over a list of channel blocks.

    blocks (in the weight's column order):
      ('x',  x_flat (N, C_j, HW),  scale (C_j,), shift (C_j,))
      ('up', level  (N, C_j, ghw), U (ghw, HW),  scale (C_j,), shift (C_j,))
    weight: (C_out, sum C_j);  bias: (C_out,).
    Returns (N, C_out, HW) in out_dtype.  The spatial axis is the lane axis;
    the last tile may be ragged (tail garbage never enters the channel
    contraction; OOB output lanes are dropped by Pallas).
    """
    c_out, c_in = weight.shape
    ts = _spatial_tile(hw, n)
    s_steps = -(-hw // ts)

    operands, in_specs, kinds = [], [], []
    wset = c_out * c_in * 2 + c_out * 4 + c_out * ts * jnp.dtype(out_dtype).itemsize
    for blk in blocks:
        if blk[0] == 'x':
            _, xv, sc, sh = blk
            cj = xv.shape[1]
            operands += [xv, sc.reshape(cj, 1), sh.reshape(cj, 1)]
            in_specs += [pl.BlockSpec((1, cj, ts), lambda nn, ss: (nn, 0, ss)),
                         pl.BlockSpec((cj, 1), lambda nn, ss: (0, 0)),
                         pl.BlockSpec((cj, 1), lambda nn, ss: (0, 0))]
            kinds.append('x')
            wset += cj * ts * xv.dtype.itemsize + cj * 8
        else:
            _, lv, U, sc, sh = blk
            cj, ghw = lv.shape[1], lv.shape[2]
            operands += [lv.astype(MATMUL_DTYPE), U.astype(MATMUL_DTYPE),
                         sc.reshape(cj, 1), sh.reshape(cj, 1)]
            in_specs += [pl.BlockSpec((1, cj, ghw), lambda nn, ss: (nn, 0, 0)),
                         pl.BlockSpec((ghw, ts), lambda nn, ss: (0, ss)),
                         pl.BlockSpec((cj, 1), lambda nn, ss: (0, 0)),
                         pl.BlockSpec((cj, 1), lambda nn, ss: (0, 0))]
            kinds.append('up')
            wset += cj * ghw * 2 + ghw * ts * 2 + cj * 8

    operands += [weight.astype(MATMUL_DTYPE),
                 bias.astype(jnp.float32).reshape(c_out, 1)]
    in_specs += [pl.BlockSpec((c_out, c_in), lambda nn, ss: (0, 0)),
                 pl.BlockSpec((c_out, 1), lambda nn, ss: (0, 0))]

    return pl.pallas_call(
        _make_fused_kernel(tuple(kinds)),
        out_shape=jax.ShapeDtypeStruct((n, c_out, hw), out_dtype),
        grid=(n, s_steps),
        in_specs=in_specs,
        out_specs=pl.BlockSpec((1, c_out, ts), lambda nn, ss: (nn, 0, ss)),
        compiler_params=pltpu.CompilerParams(
            dimension_semantics=("parallel", "parallel"),
            vmem_limit_bytes=_vmem_limit(wset)),
    )(*operands)


# ---------------------------------------------------------------------------
# Small glue: adaptive-pool / bilinear matrices, tiny pyramid-level layer
# ---------------------------------------------------------------------------
def _adaptive_pool_matrix(in_size, out_size):
    i = jnp.arange(out_size)
    starts = (i * in_size) // out_size
    ends = -((-(i + 1) * in_size) // out_size)          # ceil((i+1)*S/G)
    j = jnp.arange(in_size)
    mask = (j[None, :] >= starts[:, None]) & (j[None, :] < ends[:, None])
    return mask.astype(jnp.float32) / (ends - starts)[:, None].astype(jnp.float32)


def _bilinear_matrix(in_size, out_size):
    """PyTorch upsample_bilinear2d, align_corners=False.  Returns (out, in)."""
    if in_size == out_size:
        return jnp.eye(out_size, dtype=jnp.float32)
    scale = in_size / out_size
    o = jnp.arange(out_size, dtype=jnp.float32)
    src = jnp.maximum((o + 0.5) * scale - 0.5, 0.0)
    i0 = jnp.minimum(jnp.floor(src).astype(jnp.int32), in_size - 1)
    i1 = jnp.minimum(i0 + 1, in_size - 1)
    l1 = src - i0.astype(jnp.float32)
    l0 = 1.0 - l1
    return (l0[:, None] * jax.nn.one_hot(i0, in_size, dtype=jnp.float32)
            + l1[:, None] * jax.nn.one_hot(i1, in_size, dtype=jnp.float32))


def _small_bn_relu_conv(x_nchw, gamma, beta, w, bias, eps=EPS):
    """Pyramid-level layer (<=64 spatial positions): a pallas_call here is pure
    launch/pipeline overhead, so let XLA fuse the whole thing."""
    x32 = x_nchw.astype(jnp.float32)
    m1 = jnp.mean(x32, axis=(0, 2, 3))
    m2 = jnp.mean(x32 * x32, axis=(0, 2, 3))
    var = jnp.maximum(m2 - m1 * m1, 0.0)
    sc, sh = _bn_fold(m1, var, gamma, beta, eps)
    h = jnp.maximum(x32 * sc[None, :, None, None] + sh[None, :, None, None], 0.0)
    return jnp.einsum('oc,nchw->nohw', w, h) + bias[None, :, None, None]


# ---------------------------------------------------------------------------
# SPPWrapper forward
# ---------------------------------------------------------------------------
def spp_forward(x, params):
    N, C, H, W = x.shape
    HW = H * W
    ar = W / H

    # spp_bn: full-resolution fused BN -> ReLU -> 1x1 conv (Pallas), bf16 out.
    g, b, w, c = params['spp_bn']
    mean, var = _bn_stats_dense(x.reshape(N, C, HW))
    sc, sh = _bn_fold(mean, var, g, b)
    bt = w.shape[0]
    x0 = fused_bn_relu_conv1x1([('x', x.reshape(N, C, HW), sc, sh)],
                               w, c, N, HW, jnp.bfloat16)        # (N, bt, HW)
    x0_nchw = x0.reshape(N, bt, H, W)

    # Pyramid levels: ONE pooling pass over x0 (stacked adaptive-pool
    # matrices), tiny XLA BN->ReLU->conv per level.
    grid_sizes = [(gsz, max(1, round(ar * gsz))) for gsz in SPP_GRIDS]
    Ph_all = jnp.concatenate([_adaptive_pool_matrix(H, gh) for gh, _ in grid_sizes], axis=0)
    Pw_all = jnp.concatenate([_adaptive_pool_matrix(W, gw) for _, gw in grid_sizes], axis=0)
    pooled_all = jnp.einsum('gh,nchw,kw->ncgk', Ph_all, x0_nchw, Pw_all)

    gf, bf_, wf, cf = params['spp_fuse']
    mean0, var0 = _bn_stats_dense(x0)
    sc0, sh0 = _bn_fold(mean0, var0, gf[:bt], bf_[:bt])
    blocks = [('x', x0, sc0, sh0)]

    off, ro, co = bt, 0, 0
    for i, (gh, gw) in enumerate(grid_sizes):
        pooled = pooled_all[:, :, ro:ro + gh, co:co + gw]
        ro += gh
        co += gw
        gi, bi, wi, ci = params[f'spp{i}']
        lvl = _small_bn_relu_conv(pooled, gi, bi, wi, ci)         # (N, lvl, gh, gw)
        cj = lvl.shape[1]
        Uh = _bilinear_matrix(gh, H)                              # (H, gh)
        Uw = _bilinear_matrix(gw, W)                              # (W, gw)
        mu, vu = _bn_stats_upsampled(lvl, Uh, Uw)                 # stats of x_up, exact
        scj, shj = _bn_fold(mu, vu, gf[off:off + cj], bf_[off:off + cj])
        off += cj
        Uflat = jnp.einsum('hi,wj->ijhw', Uh, Uw).reshape(gh * gw, HW)
        blocks.append(('up', lvl.reshape(N, cj, gh * gw), Uflat, scj, shj))

    # spp_fuse: one Pallas call -- concat & upsampled levels never hit HBM.
    out = fused_bn_relu_conv1x1(blocks, wf, cf, N, HW, jnp.float32)
    return out.reshape(N, wf.shape[0], H, W)


def init_params(key, num_features, spp_size):
    bt = spp_size
    lvl = spp_size // 4
    out = spp_size
    layer_dims = ([('spp_bn', num_features, bt)]
                  + [(f'spp{i}', bt, lvl) for i in range(4)]
                  + [('spp_fuse', bt + 4 * lvl, out)])
    params = {}
    for name, cin, cout in layer_dims:
        key, k1, k2, k3, k4 = jax.random.split(key, 5)
        gamma = 1.0 + 0.1 * jax.random.normal(k1, (cin,), jnp.float32)
        beta = 0.1 * jax.random.normal(k2, (cin,), jnp.float32)
        # Conv2d(cin, cout, k=1) weight (cout, cin, 1, 1) with the 1x1 squeezed.
        w = 0.05 * jax.random.normal(k3, (cout, cin), jnp.float32)
        bias = 0.05 * jax.random.normal(k4, (cout,), jnp.float32)
        params[name] = (gamma, beta, w, bias)
    return params


if __name__ == "__main__":
    # Small but consistent config: SPPWrapper(num_features=32, spp_size=64)
    num_features, spp_size = 32, 64
    N, H, W = 2, 16, 16

    key = jax.random.PRNGKey(0)
    key, kx = jax.random.split(key)
    x = jax.random.normal(kx, (N, num_features, H, W), jnp.float32)
    params = init_params(key, num_features, spp_size)

    fwd = jax.jit(spp_forward)
    y = fwd(x, params)
    jax.block_until_ready(y)

    assert y.shape == (N, spp_size, H, W), y.shape
    assert y.dtype == jnp.float32
    assert bool(jnp.all(jnp.isfinite(y)))
    print("KERNEL_OK")
</pallas_src>

<mosaic_0001>
module attributes {stable_mosaic.version = 11 : i64} {
  func.func @kernel(%arg0: i32, %arg1: i32, %arg2: memref<1x32x128xf32, #tpu.memory_space<vmem>>, %arg3: memref<32x1xf32, #tpu.memory_space<vmem>>, %arg4: memref<32x1xf32, #tpu.memory_space<vmem>>, %arg5: memref<64x32xbf16, #tpu.memory_space<vmem>>, %arg6: memref<64x1xf32, #tpu.memory_space<vmem>>, %arg7: memref<1x64x128xbf16, #tpu.memory_space<vmem>>) attributes {dimension_semantics = [#tpu.dimension_semantics<parallel>, #tpu.dimension_semantics<parallel>], iteration_bounds = array<i64: 2, 2>, scalar_prefetch = 0 : i64, scratch_operands = 0 : i64, tpu.core_type = #tpu.core_type<tc>, window_params = [{transform_indices = @transform_0, window_bounds = array<i64: 1, 32, 128>}, {pipeline_mode = #tpu.pipeline_mode<synchronous>, transform_indices = @transform_1, window_bounds = array<i64: 32, 1>}, {pipeline_mode = #tpu.pipeline_mode<synchronous>, transform_indices = @transform_2, window_bounds = array<i64: 32, 1>}, {pipeline_mode = #tpu.pipeline_mode<synchronous>, transform_indices = @transform_3, window_bounds = array<i64: 64, 32>}, {pipeline_mode = #tpu.pipeline_mode<synchronous>, transform_indices = @transform_4, window_bounds = array<i64: 64, 1>}, {transform_indices = @transform_5, window_bounds = array<i64: 1, 64, 128>}]} {
    %c0 = arith.constant 0 : index
    %c0_0 = arith.constant 0 : index
    %c0_1 = arith.constant 0 : index
    %0 = vector.load %arg2[%c0, %c0_0, %c0_1] : memref<1x32x128xf32, #tpu.memory_space<vmem>>, vector<1x32x128xf32>
    %1 = vector.shape_cast %0 : vector<1x32x128xf32> to vector<32x128xf32>
    %c0_2 = arith.constant 0 : index
    %c0_3 = arith.constant 0 : index
    %2 = vector.load %arg3[%c0_2, %c0_3] : memref<32x1xf32, #tpu.memory_space<vmem>>, vector<32x1xf32>
    %3 = vector.broadcast %2 : vector<32x1xf32> to vector<32x128xf32>
    %4 = arith.mulf %1, %3 : vector<32x128xf32>
    %c0_4 = arith.constant 0 : index
    %c0_5 = arith.constant 0 : index
    %5 = vector.load %arg4[%c0_4, %c0_5] : memref<32x1xf32, #tpu.memory_space<vmem>>, vector<32x1xf32>
    %6 = vector.broadcast %5 : vector<32x1xf32> to vector<32x128xf32>
    %7 = arith.addf %4, %6 : vector<32x128xf32>
    %cst = arith.constant 0.000000e+00 : f32
    %8 = vector.broadcast %cst : f32 to vector<32x128xf32>
    %9 = arith.maximumf %7, %8 : vector<32x128xf32>
    %10 = arith.truncf %9 : vector<32x128xf32> to vector<32x128xbf16>
    %c0_6 = arith.constant 0 : index
    %c0_7 = arith.constant 0 : index
    %11 = vector.load %arg5[%c0_6, %c0_7] : memref<64x32xbf16, #tpu.memory_space<vmem>>, vector<64x32xbf16>
    %cst_8 = arith.constant dense<0.000000e+00> : vector<64x128xf32>
    %12 = tpu.matmul %11, %10, %cst_8 {dimension_numbers = #tpu.dot_dimension_numbers<[1], [0], [0], [1], [0, 0, 1, 1], [], []>} : vector<64x32xbf16>, vector<32x128xbf16>, vector<64x128xf32> -> vector<64x128xf32>
    %c0_9 = arith.constant 0 : index
    %c0_10 = arith.constant 0 : index
    %13 = vector.load %arg6[%c0_9, %c0_10] : memref<64x1xf32, #tpu.memory_space<vmem>>, vector<64x1xf32>
    %14 = vector.broadcast %13 : vector<64x1xf32> to vector<64x128xf32>
    %15 = arith.addf %12, %14 : vector<64x128xf32>
    %16 = arith.truncf %15 : vector<64x128xf32> to vector<64x128xbf16>
    %c0_11 = arith.constant 0 : index
    %c0_12 = arith.constant 0 : index
    %c0_13 = arith.constant 0 : index
    %17 = vector.load %arg7[%c0_11, %c0_12, %c0_13] : memref<1x64x128xbf16, #tpu.memory_space<vmem>>, vector<1x64x128xbf16>
    %18 = vector.shape_cast %17 : vector<1x64x128xbf16> to vector<64x128xbf16>
    %19 = vector.shape_cast %16 : vector<64x128xbf16> to vector<1x64x128xbf16>
    tpu.vector_store %arg7[%c0_11, %c0_12, %c0_13], %19 {strides = array<i32>} : memref<1x64x128xbf16, #tpu.memory_space<vmem>>, vector<1x64x128xbf16>,
    return
  }
  func.func @transform_0(%arg0: i32, %arg1: i32) -> (i32, i32, i32) {
    %c0_i32 = arith.constant 0 : i32
    %c0_i32_0 = arith.constant 0 : i32
    return %arg0, %c0_i32, %arg1 : i32, i32, i32
  }
  func.func @transform_1(%arg0: i32, %arg1: i32) -> (i32, i32) {
    %c0_i32 = arith.constant 0 : i32
    %c0_i32_0 = arith.constant 0 : i32
    %c0_i32_1 = arith.constant 0 : i32
    return %c0_i32, %c0_i32_0 : i32, i32
  }
  func.func @transform_2(%arg0: i32, %arg1: i32) -> (i32, i32) {
    %c0_i32 = arith.constant 0 : i32
    %c0_i32_0 = arith.constant 0 : i32
    %c0_i32_1 = arith.constant 0 : i32
    return %c0_i32, %c0_i32_0 : i32, i32
  }
  func.func @transform_3(%arg0: i32, %arg1: i32) -> (i32, i32) {
    %c0_i32 = arith.constant 0 : i32
    %c0_i32_0 = arith.constant 0 : i32
    %c0_i32_1 = arith.constant 0 : i32
    return %c0_i32, %c0_i32_0 : i32, i32
  }
  func.func @transform_4(%arg0: i32, %arg1: i32) -> (i32, i32) {
    %c0_i32 = arith.constant 0 : i32
    %c0_i32_0 = arith.constant 0 : i32
    %c0_i32_1 = arith.constant 0 : i32
    return %c0_i32, %c0_i32_0 : i32, i32
  }
  func.func @transform_5(%arg0: i32, %arg1: i32) -> (i32, i32, i32) {
    %c0_i32 = arith.constant 0 : i32
    %c0_i32_0 = arith.constant 0 : i32
    return %arg0, %c0_i32, %arg1 : i32, i32, i32
  }
}

module attributes {stable_mosaic.version = 11 : i64} {
  func.func @kernel(%arg0: i32, %arg1: i32, %arg2: memref<1x64x128xbf16, #tpu.memory_space<vmem>>, %arg3: memref<64x1xf32, #tpu.memory_space<vmem>>, %arg4: memref<64x1xf32, #tpu.memory_space<vmem>>, %arg5: memref<1x16x64xbf16, #tpu.memory_space<vmem>>, %arg6: memref<64x128xbf16, #tpu.memory_space<vmem>>, %arg7: memref<16x1xf32, #tpu.memory_space<vmem>>, %arg8: memref<16x1xf32, #tpu.memory_space<vmem>>, %arg9: memref<1x16x16xbf16, #tpu.memory_space<vmem>>, %arg10: memref<16x128xbf16, #tpu.memory_space<vmem>>, %arg11: memref<16x1xf32, #tpu.memory_space<vmem>>, %arg12: memref<16x1xf32, #tpu.memory_space<vmem>>, %arg13: memref<1x16x4xbf16, #tpu.memory_space<vmem>>, %arg14: memref<4x128xbf16, #tpu.memory_space<vmem>>, %arg15: memref<16x1xf32, #tpu.memory_space<vmem>>, %arg16: memref<16x1xf32, #tpu.memory_space<vmem>>, %arg17: memref<1x16x1xbf16, #tpu.memory_space<vmem>>, %arg18: memref<1x128xbf16, #tpu.memory_space<vmem>>, %arg19: memref<16x1xf32, #tpu.memory_space<vmem>>, %arg20: memref<16x1xf32, #tpu.memory_space<vmem>>, %arg21: memref<64x128xbf16, #tpu.memory_space<vmem>>, %arg22: memref<64x1xf32, #tpu.memory_space<vmem>>, %arg23: memref<1x64x128xf32, #tpu.memory_space<vmem>>) attributes {dimension_semantics = [#tpu.dimension_semantics<parallel>, #tpu.dimension_semantics<parallel>], iteration_bounds = array<i64: 2, 2>, scalar_prefetch = 0 : i64, scratch_operands = 0 : i64, tpu.core_type = #tpu.core_type<tc>, window_params = [{transform_indices = @transform_0, window_bounds = array<i64: 1, 64, 128>}, {pipeline_mode = #tpu.pipeline_mode<synchronous>, transform_indices = @transform_1, window_bounds = array<i64: 64, 1>}, {pipeline_mode = #tpu.pipeline_mode<synchronous>, transform_indices = @transform_2, window_bounds = array<i64: 64, 1>}, {transform_indices = @transform_3, window_bounds = array<i64: 1, 16, 64>}, {transform_indices = @transform_4, window_bounds = array<i64: 64, 128>}, {pipeline_mode = #tpu.pipeline_mode<synchronous>, transform_indices = @transform_5, window_bounds = array<i64: 16, 1>}, {pipeline_mode = #tpu.pipeline_mode<synchronous>, transform_indices = @transform_6, window_bounds = array<i64: 16, 1>}, {transform_indices = @transform_7, window_bounds = array<i64: 1, 16, 16>}, {transform_indices = @transform_8, window_bounds = array<i64: 16, 128>}, {pipeline_mode = #tpu.pipeline_mode<synchronous>, transform_indices = @transform_9, window_bounds = array<i64: 16, 1>}, {pipeline_mode = #tpu.pipeline_mode<synchronous>, transform_indices = @transform_10, window_bounds = array<i64: 16, 1>}, {transform_indices = @transform_11, window_bounds = array<i64: 1, 16, 4>}, {transform_indices = @transform_12, window_bounds = array<i64: 4, 128>}, {pipeline_mode = #tpu.pipeline_mode<synchronous>, transform_indices = @transform_13, window_bounds = array<i64: 16, 1>}, {pipeline_mode = #tpu.pipeline_mode<synchronous>, transform_indices = @transform_14, window_bounds = array<i64: 16, 1>}, {transform_indices = @transform_15, window_bounds = array<i64: 1, 16, 1>}, {transform_indices = @transform_16, window_bounds = array<i64: 1, 128>}, {pipeline_mode = #tpu.pipeline_mode<synchronous>, transform_indices = @transform_17, window_bounds = array<i64: 16, 1>}, {pipeline_mode = #tpu.pipeline_mode<synchronous>, transform_indices = @transform_18, window_bounds = array<i64: 16, 1>}, {pipeline_mode = #tpu.pipeline_mode<synchronous>, transform_indices = @transform_19, window_bounds = array<i64: 64, 128>}, {pipeline_mode = #tpu.pipeline_mode<synchronous>, transform_indices = @transform_20, window_bounds = array<i64: 64, 1>}, {transform_indices = @transform_21, window_bounds = array<i64: 1, 64, 128>}]} {
    %c0 = arith.constant 0 : index
    %c0_0 = arith.constant 0 : index
    %c0_1 = arith.constant 0 : index
    %0 = vector.load %arg2[%c0, %c0_0, %c0_1] : memref<1x64x128xbf16, #tpu.memory_space<vmem>>, vector<1x64x128xbf16>
    %1 = vector.shape_cast %0 : vector<1x64x128xbf16> to vector<64x128xbf16>
    %2 = arith.extf %1 : vector<64x128xbf16> to vector<64x128xf32>
    %c0_2 = arith.constant 0 : index
    %c0_3 = arith.constant 0 : index
    %3 = vector.load %arg3[%c0_2, %c0_3] : memref<64x1xf32, #tpu.memory_space<vmem>>, vector<64x1xf32>
    %4 = vector.broadcast %3 : vector<64x1xf32> to vector<64x128xf32>
    %5 = arith.mulf %2, %4 : vector<64x128xf32>
    %c0_4 = arith.constant 0 : index
    %c0_5 = arith.constant 0 : index
    %6 = vector.load %arg4[%c0_4, %c0_5] : memref<64x1xf32, #tpu.memory_space<vmem>>, vector<64x1xf32>
    %7 = vector.broadcast %6 : vector<64x1xf32> to vector<64x128xf32>
    %8 = arith.addf %5, %7 : vector<64x128xf32>
    %cst = arith.constant 0.000000e+00 : f32
    %9 = vector.broadcast %cst : f32 to vector<64x128xf32>
    %10 = arith.maximumf %8, %9 : vector<64x128xf32>
    %11 = arith.truncf %10 : vector<64x128xf32> to vector<64x128xbf16>
    %c0_6 = arith.constant 0 : index
    %c0_7 = arith.constant 0 : index
    %c0_8 = arith.constant 0 : index
    %12 = vector.load %arg5[%c0_6, %c0_7, %c0_8] : memref<1x16x64xbf16, #tpu.memory_space<vmem>>, vector<1x16x64xbf16>
    %13 = vector.shape_cast %12 : vector<1x16x64xbf16> to vector<16x64xbf16>
    %c0_9 = arith.constant 0 : index
    %c0_10 = arith.constant 0 : index
    %14 = vector.load %arg6[%c0_9, %c0_10] : memref<64x128xbf16, #tpu.memory_space<vmem>>, vector<64x128xbf16>
    %cst_11 = arith.constant dense<0.000000e+00> : vector<16x128xf32>
    %15 = tpu.matmul %13, %14, %cst_11 {dimension_numbers = #tpu.dot_dimension_numbers<[1], [0], [0], [1], [0, 0, 1, 1], [], []>} : vector<16x64xbf16>, vector<64x128xbf16>, vector<16x128xf32> -> vector<16x128xf32>
    %c0_12 = arith.constant 0 : index
    %c0_13 = arith.constant 0 : index
    %16 = vector.load %arg7[%c0_12, %c0_13] : memref<16x1xf32, #tpu.memory_space<vmem>>, vector<16x1xf32>
    %17 = vector.broadcast %16 : vector<16x1xf32> to vector<16x128xf32>
    %18 = arith.mulf %15, %17 : vector<16x128xf32>
    %c0_14 = arith.constant 0 : index
    %c0_15 = arith.constant 0 : index
    %19 = vector.load %arg8[%c0_14, %c0_15] : memref<16x1xf32, #tpu.memory_space<vmem>>, vector<16x1xf32>
    %20 = vector.broadcast %19 : vector<16x1xf32> to vector<16x128xf32>
    %21 = arith.addf %18, %20 : vector<16x128xf32>
    %cst_16 = arith.constant 0.000000e+00 : f32
    %22 = vector.broadcast %cst_16 : f32 to vector<16x128xf32>
    %23 = arith.maximumf %21, %22 : vector<16x128xf32>
    %24 = arith.truncf %23 : vector<16x128xf32> to vector<16x128xbf16>
    %c0_17 = arith.constant 0 : index
    %c0_18 = arith.constant 0 : index
    %c0_19 = arith.constant 0 : index
    %25 = vector.load %arg9[%c0_17, %c0_18, %c0_19] : memref<1x16x16xbf16, #tpu.memory_space<vmem>>, vector<1x16x16xbf16>
    %26 = vector.shape_cast %25 : vector<1x16x16xbf16> to vector<16x16xbf16>
    %c0_20 = arith.constant 0 : index
    %c0_21 = arith.constant 0 : index
    %27 = vector.load %arg10[%c0_20, %c0_21] : memref<16x128xbf16, #tpu.memory_space<vmem>>, vector<16x128xbf16>
    %cst_22 = arith.constant dense<0.000000e+00> : vector<16x128xf32>
    %28 = tpu.matmul %26, %27, %cst_22 {dimension_numbers = #tpu.dot_dimension_numbers<[1], [0], [0], [1], [0, 0, 1, 1], [], []>} : vector<16x16xbf16>, vector<16x128xbf16>, vector<16x128xf32> -> vector<16x128xf32>
    %c0_23 = arith.constant 0 : index
    %c0_24 = arith.constant 0 : index
    %29 = vector.load %arg11[%c0_23, %c0_24] : memref<16x1xf32, #tpu.memory_space<vmem>>, vector<16x1xf32>
    %30 = vector.broadcast %29 : vector<16x1xf32> to vector<16x128xf32>
    %31 = arith.mulf %28, %30 : vector<16x128xf32>
    %c0_25 = arith.constant 0 : index
    %c0_26 = arith.constant 0 : index
    %32 = vector.load %arg12[%c0_25, %c0_26] : memref<16x1xf32, #tpu.memory_space<vmem>>, vector<16x1xf32>
    %33 = vector.broadcast %32 : vector<16x1xf32> to vector<16x128xf32>
    %34 = arith.addf %31, %33 : vector<16x128xf32>
    %cst_27 = arith.constant 0.000000e+00 : f32
    %35 = vector.broadcast %cst_27 : f32 to vector<16x128xf32>
    %36 = arith.maximumf %34, %35 : vector<16x128xf32>
    %37 = arith.truncf %36 : vector<16x128xf32> to vector<16x128xbf16>
    %c0_28 = arith.constant 0 : index
    %c0_29 = arith.constant 0 : index
    %c0_30 = arith.constant 0 : index
    %38 = vector.load %arg13[%c0_28, %c0_29, %c0_30] : memref<1x16x4xbf16, #tpu.memory_space<vmem>>, vector<1x16x4xbf16>
    %39 = vector.shape_cast %38 : vector<1x16x4xbf16> to vector<16x4xbf16>
    %40 = arith.extf %39 : vector<16x4xbf16> to vector<16x4xf32>
    %c0_31 = arith.constant 0 : index
    %c0_32 = arith.constant 0 : index
    %41 = vector.load %arg14[%c0_31, %c0_32] : memref<4x128xbf16, #tpu.memory_space<vmem>>, vector<4x128xbf16>
    %42 = arith.extf %41 : vector<4x128xbf16> to vector<4x128xf32>
    %43 = vector.extract_strided_slice %40 {offsets = [0, 0], sizes = [16, 1], strides = [1, 1]} : vector<16x4xf32> to vector<16x1xf32>
    %44 = vector.extract_strided_slice %42 {offsets = [0, 0], sizes = [1, 128], strides = [1, 1]} : vector<4x128xf32> to vector<1x128xf32>
    %45 = vector.broadcast %43 : vector<16x1xf32> to vector<16x128xf32>
    %46 = vector.broadcast %44 : vector<1x128xf32> to vector<16x128xf32>
    %47 = arith.mulf %45, %46 : vector<16x128xf32>
    %48 = vector.extract_strided_slice %40 {offsets = [0, 1], sizes = [16, 1], strides = [1, 1]} : vector<16x4xf32> to vector<16x1xf32>
    %49 = vector.extract_strided_slice %42 {offsets = [1, 0], sizes = [1, 128], strides = [1, 1]} : vector<4x128xf32> to vector<1x128xf32>
    %50 = vector.broadcast %48 : vector<16x1xf32> to vector<16x128xf32>
    %51 = vector.broadcast %49 : vector<1x128xf32> to vector<16x128xf32>
    %52 = arith.mulf %50, %51 : vector<16x128xf32>
    %53 = arith.addf %47, %52 : vector<16x128xf32>
    %54 = vector.extract_strided_slice %40 {offsets = [0, 2], sizes = [16, 1], strides = [1, 1]} : vector<16x4xf32> to vector<16x1xf32>
    %55 = vector.extract_strided_slice %42 {offsets = [2, 0], sizes = [1, 128], strides = [1, 1]} : vector<4x128xf32> to vector<1x128xf32>
    %56 = vector.broadcast %54 : vector<16x1xf32> to vector<16x128xf32>
    %57 = vector.broadcast %55 : vector<1x128xf32> to vector<16x128xf32>
    %58 = arith.mulf %56, %57 : vector<16x128xf32>
    %59 = arith.addf %53, %58 : vector<16x128xf32>
    %60 = vector.extract_strided_slice %40 {offsets = [0, 3], sizes = [16, 1], strides = [1, 1]} : vector<16x4xf32> to vector<16x1xf32>
    %61 = vector.extract_strided_slice %42 {offsets = [3, 0], sizes = [1, 128], strides = [1, 1]} : vector<4x128xf32> to vector<1x128xf32>
    %62 = vector.broadcast %60 : vector<16x1xf32> to vector<16x128xf32>
    %63 = vector.broadcast %61 : vector<1x128xf32> to vector<16x128xf32>
    %64 = arith.mulf %62, %63 : vector<16x128xf32>
    %65 = arith.addf %59, %64 : vector<16x128xf32>
    %c0_33 = arith.constant 0 : index
    %c0_34 = arith.constant 0 : index
    %66 = vector.load %arg15[%c0_33, %c0_34] : memref<16x1xf32, #tpu.memory_space<vmem>>, vector<16x1xf32>
    %67 = vector.broadcast %66 : vector<16x1xf32> to vector<16x128xf32>
    %68 = arith.mulf %65, %67 : vector<16x128xf32>
    %c0_35 = arith.constant 0 : index
    %c0_36 = arith.constant 0 : index
    %69 = vector.load %arg16[%c0_35, %c0_36] : memref<16x1xf32, #tpu.memory_space<vmem>>, vector<16x1xf32>
    %70 = vector.broadcast %69 : vector<16x1xf32> to vector<16x128xf32>
    %71 = arith.addf %68, %70 : vector<16x128xf32>
    %cst_37 = arith.constant 0.000000e+00 : f32
    %72 = vector.broadcast %cst_37 : f32 to vector<16x128xf32>
    %73 = arith.maximumf %71, %72 : vector<16x128xf32>
    %74 = arith.truncf %73 : vector<16x128xf32> to vector<16x128xbf16>
    %c0_38 = arith.constant 0 : index
    %c0_39 = arith.constant 0 : index
    %c0_40 = arith.constant 0 : index
    %75 = vector.load %arg17[%c0_38, %c0_39, %c0_40] : memref<1x16x1xbf16, #tpu.memory_space<vmem>>, vector<1x16x1xbf16>
    %76 = vector.shape_cast %75 : vector<1x16x1xbf16> to vector<16x1xbf16>
    %77 = arith.extf %76 : vector<16x1xbf16> to vector<16x1xf32>
    %c0_41 = arith.constant 0 : index
    %c0_42 = arith.constant 0 : index
    %78 = vector.load %arg18[%c0_41, %c0_42] : memref<1x128xbf16, #tpu.memory_space<vmem>>, vector<1x128xbf16>
    %79 = arith.extf %78 : vector<1x128xbf16> to vector<1x128xf32>
    %80 = vector.broadcast %77 : vector<16x1xf32> to vector<16x128xf32>
    %81 = vector.broadcast %79 : vector<1x128xf32> to vector<16x128xf32>
    %82 = arith.mulf %80, %81 : vector<16x128xf32>
    %c0_43 = arith.constant 0 : index
    %c0_44 = arith.constant 0 : index
    %83 = vector.load %arg19[%c0_43, %c0_44] : memref<16x1xf32, #tpu.memory_space<vmem>>, vector<16x1xf32>
    %84 = vector.broadcast %83 : vector<16x1xf32> to vector<16x128xf32>
    %85 = arith.mulf %82, %84 : vector<16x128xf32>
    %c0_45 = arith.constant 0 : index
    %c0_46 = arith.constant 0 : index
    %86 = vector.load %arg20[%c0_45, %c0_46] : memref<16x1xf32, #tpu.memory_space<vmem>>, vector<16x1xf32>
    %87 = vector.broadcast %86 : vector<16x1xf32> to vector<16x128xf32>
    %88 = arith.addf %85, %87 : vector<16x128xf32>
    %cst_47 = arith.constant 0.000000e+00 : f32
    %89 = vector.broadcast %cst_47 : f32 to vector<16x128xf32>
    %90 = arith.maximumf %88, %89 : vector<16x128xf32>
    %91 = arith.truncf %90 : vector<16x128xf32> to vector<16x128xbf16>
    %92 = tpu.concatenate %11, %24, %37, %74, %91 in 0 : vector<64x128xbf16>, vector<16x128xbf16>, vector<16x128xbf16>, vector<16x128xbf16>, vector<16x128xbf16> -> vector<128x128xbf16>
    %c0_48 = arith.constant 0 : index
    %c0_49 = arith.constant 0 : index
    %93 = vector.load %arg21[%c0_48, %c0_49] : memref<64x128xbf16, #tpu.memory_space<vmem>>, vector<64x128xbf16>
    %cst_50 = arith.constant dense<0.000000e+00> : vector<64x128xf32>
    %94 = tpu.matmul %93, %92, %cst_50 {dimension_numbers = #tpu.dot_dimension_numbers<[1], [0], [0], [1], [0, 0, 1, 1], [], []>} : vector<64x128xbf16>, vector<128x128xbf16>, vector<64x128xf32> -> vector<64x128xf32>
    %c0_51 = arith.constant 0 : index
    %c0_52 = arith.constant 0 : index
    %95 = vector.load %arg22[%c0_51, %c0_52] : memref<64x1xf32, #tpu.memory_space<vmem>>, vector<64x1xf32>
    %96 = vector.broadcast %95 : vector<64x1xf32> to vector<64x128xf32>
    %97 = arith.addf %94, %96 : vector<64x128xf32>
    %c0_53 = arith.constant 0 : index
    %c0_54 = arith.constant 0 : index
    %c0_55 = arith.constant 0 : index
    %98 = vector.load %arg23[%c0_53, %c0_54, %c0_55] : memref<1x64x128xf32, #tpu.memory_space<vmem>>, vector<1x64x128xf32>
    %99 = vector.shape_cast %98 : vector<1x64x128xf32> to vector<64x128xf32>
    %100 = vector.shape_cast %97 : vector<64x128xf32> to vector<1x64x128xf32>
    tpu.vector_store %arg23[%c0_53, %c0_54, %c0_55], %100 {strides = array<i32>} : memref<1x64x128xf32, #tpu.memory_space<vmem>>, vector<1x64x128xf32>,
    return
  }
  func.func @transform_0(%arg0: i32, %arg1: i32) -> (i32, i32, i32) {
    %c0_i32 = arith.constant 0 : i32
    %c0_i32_0 = arith.constant 0 : i32
    return %arg0, %c0_i32, %arg1 : i32, i32, i32
  }
  func.func @transform_1(%arg0: i32, %arg1: i32) -> (i32, i32) {
    %c0_i32 = arith.constant 0 : i32
    %c0_i32_0 = arith.constant 0 : i32
    %c0_i32_1 = arith.constant 0 : i32
    return %c0_i32, %c0_i32_0 : i32, i32
  }
  func.func @transform_2(%arg0: i32, %arg1: i32) -> (i32, i32) {
    %c0_i32 = arith.constant 0 : i32
    %c0_i32_0 = arith.constant 0 : i32
    %c0_i32_1 = arith.constant 0 : i32
    return %c0_i32, %c0_i32_0 : i32, i32
  }
  func.func @transform_3(%arg0: i32, %arg1: i32) -> (i32, i32, i32) {
    %c0_i32 = arith.constant 0 : i32
    %c0_i32_0 = arith.constant 0 : i32
    %c0_i32_1 = arith.constant 0 : i32
    return %arg0, %c0_i32, %c0_i32_0 : i32, i32, i32
  }
  func.func @transform_4(%arg0: i32, %arg1: i32) -> (i32, i32) {
    %c0_i32 = arith.constant 0 : i32
    %c0_i32_0 = arith.constant 0 : i32
    return %c0_i32, %arg1 : i32, i32
  }
  func.func @transform_5(%arg0: i32, %arg1: i32) -> (i32, i32) {
    %c0_i32 = arith.constant 0 : i32
    %c0_i32_0 = arith.constant 0 : i32
    %c0_i32_1 = arith.constant 0 : i32
    return %c0_i32, %c0_i32_0 : i32, i32
  }
  func.func @transform_6(%arg0: i32, %arg1: i32) -> (i32, i32) {
    %c0_i32 = arith.constant 0 : i32
    %c0_i32_0 = arith.constant 0 : i32
    %c0_i32_1 = arith.constant 0 : i32
    return %c0_i32, %c0_i32_0 : i32, i32
  }
  func.func @transform_7(%arg0: i32, %arg1: i32) -> (i32, i32, i32) {
    %c0_i32 = arith.constant 0 : i32
    %c0_i32_0 = arith.constant 0 : i32
    %c0_i32_1 = arith.constant 0 : i32
    return %arg0, %c0_i32, %c0_i32_0 : i32, i32, i32
  }
  func.func @transform_8(%arg0: i32, %arg1: i32) -> (i32, i32) {
    %c0_i32 = arith.constant 0 : i32
    %c0_i32_0 = arith.constant 0 : i32
    return %c0_i32, %arg1 : i32, i32
  }
  func.func @transform_9(%arg0: i32, %arg1: i32) -> (i32, i32) {
    %c0_i32 = arith.constant 0 : i32
    %c0_i32_0 = arith.constant 0 : i32
    %c0_i32_1 = arith.constant 0 : i32
    return %c0_i32, %c0_i32_0 : i32, i32
  }
  func.func @transform_10(%arg0: i32, %arg1: i32) -> (i32, i32) {
    %c0_i32 = arith.constant 0 : i32
    %c0_i32_0 = arith.constant 0 : i32
    %c0_i32_1 = arith.constant 0 : i32
    return %c0_i32, %c0_i32_0 : i32, i32
  }
  func.func @transform_11(%arg0: i32, %arg1: i32) -> (i32, i32, i32) {
    %c0_i32 = arith.constant 0 : i32
    %c0_i32_0 = arith.constant 0 : i32
    %c0_i32_1 = arith.constant 0 : i32
    return %arg0, %c0_i32, %c0_i32_0 : i32, i32, i32
  }
  func.func @transform_12(%arg0: i32, %arg1: i32) -> (i32, i32) {
    %c0_i32 = arith.constant 0 : i32
    %c0_i32_0 = arith.constant 0 : i32
    return %c0_i32, %arg1 : i32, i32
  }
  func.func @transform_13(%arg0: i32, %arg1: i32) -> (i32, i32) {
    %c0_i32 = arith.constant 0 : i32
    %c0_i32_0 = arith.constant 0 : i32
    %c0_i32_1 = arith.constant 0 : i32
    return %c0_i32, %c0_i32_0 : i32, i32
  }
  func.func @transform_14(%arg0: i32, %arg1: i32) -> (i32, i32) {
    %c0_i32 = arith.constant 0 : i32
    %c0_i32_0 = arith.constant 0 : i32
    %c0_i32_1 = arith.constant 0 : i32
    return %c0_i32, %c0_i32_0 : i32, i32
  }
  func.func @transform_15(%arg0: i32, %arg1: i32) -> (i32, i32, i32) {
    %c0_i32 = arith.constant 0 : i32
    %c0_i32_0 = arith.constant 0 : i32
    %c0_i32_1 = arith.constant 0 : i32
    return %arg0, %c0_i32, %c0_i32_0 : i32, i32, i32
  }
  func.func @transform_16(%arg0: i32, %arg1: i32) -> (i32, i32) {
    %c0_i32 = arith.constant 0 : i32
    %c0_i32_0 = arith.constant 0 : i32
    return %c0_i32, %arg1 : i32, i32
  }
  func.func @transform_17(%arg0: i32, %arg1: i32) -> (i32, i32) {
    %c0_i32 = arith.constant 0 : i32
    %c0_i32_0 = arith.constant 0 : i32
    %c0_i32_1 = arith.constant 0 : i32
    return %c0_i32, %c0_i32_0 : i32, i32
  }
  func.func @transform_18(%arg0: i32, %arg1: i32) -> (i32, i32) {
    %c0_i32 = arith.constant 0 : i32
    %c0_i32_0 = arith.constant 0 : i32
    %c0_i32_1 = arith.constant 0 : i32
    return %c0_i32, %c0_i32_0 : i32, i32
  }
  func.func @transform_19(%arg0: i32, %arg1: i32) -> (i32, i32) {
    %c0_i32 = arith.constant 0 : i32
    %c0_i32_0 = arith.constant 0 : i32
    %c0_i32_1 = arith.constant 0 : i32
    return %c0_i32, %c0_i32_0 : i32, i32
  }
  func.func @transform_20(%arg0: i32, %arg1: i32) -> (i32, i32) {
    %c0_i32 = arith.constant 0 : i32
    %c0_i32_0 = arith.constant 0 : i32
    %c0_i32_1 = arith.constant 0 : i32
    return %c0_i32, %c0_i32_0 : i32, i32
  }
  func.func @transform_21(%arg0: i32, %arg1: i32) -> (i32, i32, i32) {
    %c0_i32 = arith.constant 0 : i32
    %c0_i32_0 = arith.constant 0 : i32
    return %arg0, %c0_i32, %arg1 : i32, i32, i32
  }
}

</mosaic_0001>

<bundles_post_ra>
// kernel: spp_forward.2
= control target key start
LH: loop header
LB: loop body
LE: loop exit
PB: predicated region body
PF: predicated region fallthrough
CT: control target
= control target key end

     0   :  { %s928_s18 = smov 0   ;;  %s930_s19 = smov 0   ;;  %s1092_s0 = inlined_call_operand.vmem [shape: f32[2,32,256], index: 0, kind: input, shape index: {}]   ;;  %s1093_s1 = inlined_call_operand.vmem [shape: f32[32,1], index: 1, kind: input, shape index: {}]   ;;  %s1094_s2 = inlined_call_operand.vmem [shape: f32[32,1], index: 2, kind: input, shape index: {}]   ;;  %s1095_s3 = inlined_call_operand.vmem [shape: bf16[64,32], index: 3, kind: input, shape index: {}]   ;;  %s1096_s4 = inlined_call_operand.vmem [shape: f32[64,1], index: 4, kind: input, shape index: {}]   ;;  %s1097_s5 = inlined_call_operand.vmem [shape: bf16[2,64,256], index: 5, kind: output, shape index: {}]  }
   0x1   :  { %s932_s20 = smov 0   ;;  %s934_s21 = smov 0  }
   0x2   :  { %s936_s22 = smov 0   ;;  %s938_s23 = smov 0  }
   0x3   :  { %s940_s24 = smov 0  }
   0x4 LB: > { %s24_s25 = sadd.s32 1, %s887_s22  ;;  %s27_s26 = sadd.s32 1, %s891_s23  ;;  %s895_s24 = sphi %s940_s24, %s15_s24   ;;  %s891_s23 = sphi %s938_s23, %s1104_s23   ;;  %s887_s22 = sphi %s936_s22, %s1103_s22   ;;  %s883_s21 = sphi %s934_s21, %s1102_s21   ;;  %s879_s20 = sphi %s932_s20, %s1101_s20   ;;  %s875_s19 = sphi %s930_s19, %s1100_s19   ;;  %s871_s18 = sphi %s928_s18, %s1099_s18  }
   0x5   : > { %p25_p0 = scmp.ge.s32.totalorder %s24_s25, 2  ;;  %s694_s27 = sadd.s32 4294967295, %s895_s24  }
   0x6   : > { %p43_p1 = scmp.ne.s32.totalorder %s875_s19, %s871_s18  ;;  %p44_p2 = scmp.eq.s32.totalorder %s895_s24, 0 }
   0x7   : > { %s1106_s25 = smov (%p25_p0, %s24_s25), 0  ;;  %s1108_s26 = smov (!%p25_p0, %s27_s26), %s891_s23 }
   0x8   : > { %p29_p3 = scmp.ge.s32.totalorder %s1108_s26, 2  ;;  %p159_p4 = scmp.eq.s32.totalorder %s694_s27, 3 }
   0x9   : > { %s32_s28 = ssub.s32 %s887_s22, %s1106_s25  ;;  %p45_p5 = por %p44_p2, %p43_p1 }
   0xa   : > { %s1110_s26 = smov (%p29_p3, %s1108_s26), 0  ;;  %p976_p6 = por %p159_p4, %p43_p1 }
   0xb   : > { %s31_s30 = ssub.s32 %s891_s23, %s1110_s26  ;;  %s36_s7 = sadd.s32 1, %s875_s19 }
   0xc   : > { %s33_s6 = sor.u32 %s32_s28, %s31_s30  ;;  %p697_p8 = scmp.ge.s32.totalorder %s895_s24, 4 }
   0xd   : > { %p34_p7 = scmp.eq.s32.totalorder %s33_s6, 0 }
   0xe   : > { %193 = sbr.rel (%p697_p8) target bundleno = 29 (0x1d), region = 32 }
   0xf   : > { %s984_s8 = scalar_select %p34_p7, %s875_s19, %s36_s7  }
  0x15   : > { %196 = sbr.rel (!%p45_p5) target bundleno = 29 (0x1d), region = 36  ;;  %s198_s9 = sand.u32 (%p45_p5), 1, %s875_s19  }
  0x16   : > { %s699_s10 = sshll.u32 (%p45_p5), %s891_s23, 3  ;;  %s698_s11 = sshll.u32 (%p45_p5), %s198_s9, 5 }
  0x17   : > { %s202_s12 = sadd.s32 (%p45_p5), %s887_s22, %s699_s10  ;;  %s200_s17 = scalar_lea.vmem (%p45_p5), [#allocation2], %s698_s11 }
  0x18   : > { %s700_s13 = sshll.u32 (%p45_p5), %s202_s12, 3 }
  0x19   : > { %s204_s16 = scalar_lea.vmem (%p45_p5), %s1092_s0, %s700_s13 }
  0x1a   : > { %v238_v0 = vld [vmem:[%s204_s16] sm:$0xff] (%p45_p5)  ;;  %v240_v1 = vld [vmem:[%s204_s16 + $0x10] sm:$0xff] (%p45_p5) }
  0x1b   : > { %v242_v2 = vld [vmem:[%s204_s16 + $0x20] sm:$0xff] (%p45_p5)  ;;  %239 = vst [vmem:[%s200_s17] sm:$0xff] (%p45_p5), %v238_v0  ;;  %241 = vst [vmem:[%s200_s17 + $0x8] sm:$0xff] (%p45_p5), %v240_v1  ;;  %v244_v3 = vld [vmem:[%s204_s16 + $0x30] sm:$0xff] (%p45_p5) }
  0x1c   : > { %243 = vst [vmem:[%s200_s17 + $0x10] sm:$0xff] %v242_v2  ;;  %245 = vst [vmem:[%s200_s17 + $0x18] sm:$0xff] %v244_v3 }
  0x1d PF: > { %p701_p9 = scmp.ge.s32.totalorder %s895_s24, 1  ;;  %p250_p10 = scmp.lt.s32.totalorder %s895_s24, 5 }
  0x1f   : > { %p251_p11 = pnand %p701_p9, %p250_p10 }
  0x20   : > { %v316_v4 = vld [vmem:[%s1094_s2] sm:$0xff] (!%p251_p11)  ;;  %v897_v6 = vmov (!%p251_p11), 0   ;;  %v317_v7 = vld [vmem:[%s1094_s2 + $0x8] sm:$0xff] (!%p251_p11)  ;;  %v291_v9 = vld [vmem:[%s1093_s1 + $0x18] sm:$0xff] (!%p251_p11)  ;;  %vm426_vm0 = vcmask (!%p251_p11), 261120   ;;  %s257_s12 = sand.u32 (!%p251_p11), 1, %s871_s18  }
  0x21   : > { %254 = sbr.rel (%p251_p11) target bundleno = 416 (0x1a0), region = 74  ;;  %v288_v5 = vld [vmem:[%s1093_s1] sm:$0xff] (!%p251_p11)  ;;  %836 = vset.pattern.permute.xlu1 (!%p251_p11), %v897_v6  ;;  %835 = vset.pattern.permute.xlu0 (!%p251_p11), %v897_v6  ;;  %v289_v8 = vld [vmem:[%s1093_s1 + $0x8] sm:$0xff] (!%p251_p11)  ;;  %v290_v10 = vld [vmem:[%s1093_s1 + $0x10] sm:$0xff] (!%p251_p11)  ;;  %s1052_s13 = sshll.u32 (!%p251_p11), %s257_s12, 5 }
  0x22   : > { %322 = vperm.xlu1 (!%p251_p11), %836, %v316_v4   ;;  %294 = vperm.xlu0 (!%p251_p11), %835, %v288_v5   ;;  %v319_v11 = vld [vmem:[%s1094_s2 + $0x18] sm:$0xff] (!%p251_p11)  ;;  %v318_v12 = vld [vmem:[%s1094_s2 + $0x10] sm:$0xff] (!%p251_p11)  ;;  %v359_v13 = vld [vmem:[%s1096_s4 + $0x8] sm:$0xff] (!%p251_p11)  ;;  %s259_s14 = scalar_lea.vmem (!%p251_p11), [#allocation2], %s1052_s13  ;;  %s282_s27 = scalar_lea.vmem (!%p251_p11), [#allocation3], %s1052_s13 }
  0x23   : > { %v358_v14 = vld [vmem:[%s1096_s4] sm:$0xff] (!%p251_p11)  ;;  %v361_v15 = vld [vmem:[%s1096_s4 + $0x18] sm:$0xff] (!%p251_p11)  ;;  %v360_v16 = vld [vmem:[%s1096_s4 + $0x10] sm:$0xff] (!%p251_p11) }
  0x24   : > { %v837_v17 = vld [vmem:[%s1095_s3] sm:$0xff] (!%p251_p11)   ;;  %v838_v18 = vld [vmem:[%s1095_s3 + $0x10] sm:$0xff] (!%p251_p11)   ;;  %v363_v19 = vld [vmem:[%s1096_s4 + $0x28] sm:$0xff] (!%p251_p11) }
  0x25   : > { %v362_v20 = vld [vmem:[%s1096_s4 + $0x20] sm:$0xff] (!%p251_p11)  ;;  %766 = vmatprep.mubr.msk.bf16.mxu0 (!%p251_p11), %vm426_vm0, %v837_v17  ;;  %770 = vmatprep.mubr.msk.bf16.mxu1 (!%p251_p11), %vm426_vm0, %v838_v18  ;;  %v365_v21 = vld [vmem:[%s1096_s4 + $0x38] sm:$0xff] (!%p251_p11)  ;;  %v364_v22 = vld [vmem:[%s1096_s4 + $0x30] sm:$0xff] (!%p251_p11) }
  0x26   : > { %327 = vperm.xlu1 (!%p251_p11), %836, %v317_v7   ;;  %299 = vperm.xlu0 (!%p251_p11), %835, %v289_v8   ;;  %v284_v23 = vld [vmem:[%s259_s14] sm:$0xff] (!%p251_p11)  ;;  %v285_v27 = vld [vmem:[%s259_s14 + $0x8] sm:$0xff] (!%p251_p11)  ;;  %v287_v34 = vld [vmem:[%s259_s14 + $0x18] sm:$0xff] (!%p251_p11) }
  0x27   : > { %v286_v36 = vld [vmem:[%s259_s14 + $0x10] sm:$0xff] (!%p251_p11)  ;;  %v839_v49 = vld [vmem:[%s1095_s3 + $0x8] sm:$0xff] (!%p251_p11)   ;;  %v840_v50 = vld [vmem:[%s1095_s3 + $0x18] sm:$0xff] (!%p251_p11)  }
  0x28   : > { %s721_s28 = sshll.u32 (%p976_p6), %s883_s21, 4 }
  0x29   : > { %s552_s30 = sadd.s32 (%p976_p6), %s879_s20, %s721_s28 }
  0x2a   : > { %309 = vperm.xlu1 %836, %v291_v9   ;;  %304 = vperm.xlu0 %835, %v290_v10   ;;  %s722_s6 = sshll.u32 (%p976_p6), %s552_s30, 2 }
  0x2b   : > { %s554_s10 = scalar_lea.vmem (%p976_p6), %s1097_s5, %s722_s6 }
  0x2e   : > { %337 = vperm.xlu1 %836, %v319_v11   ;;  %332 = vperm.xlu0 %835, %v318_v12  }
  0x32   : > { %373 = vperm.xlu1 %836, %v359_v13   ;;  %368 = vperm.xlu0 %835, %v358_v14  }
  0x36   : > { %383 = vperm.xlu1 %836, %v361_v15   ;;  %378 = vperm.xlu0 %835, %v360_v16  }
  0x3a   : > { %393 = vperm.xlu1 %836, %v363_v19   ;;  %388 = vperm.xlu0 %835, %v362_v20  }
  0x3e   : > { %403 = vperm.xlu1 %836, %v365_v21   ;;  %398 = vperm.xlu0 %835, %v364_v22  }
  0xa1   : > { %v323_v24 = vpop.permute.xlu1 %322  ;;  %v295_v25 = vpop.permute.xlu0 %294 }
  0xa2   : > { %v312_v26 = vmul.f32 %v295_v25, %v284_v23 }
  0xa4   : > { %v340_v30 = vadd.f32 %v323_v24, %v312_v26 }
  0xa5   : > { %v328_v28 = vpop.permute.xlu1 %327  ;;  %v300_v29 = vpop.permute.xlu0 %299 }
  0xa6   : > { %v313_v31 = vmul.f32 %v300_v29, %v285_v27  ;;  %v344_v37 = vmax.f32 %v340_v30, 0.0 }
  0xa8   : > { %v341_v32 = vadd.f32 %v328_v28, %v313_v31 }
  0xa9   : > { %v310_v33 = vpop.permute.xlu1 %309  ;;  %v305_v35 = vpop.permute.xlu0 %304 }
  0xaa   : > { %v345_v38 = vmax.f32 %v341_v32, 0.0  ;;  %v315_v40 = vmul.f32 %v310_v33, %v287_v34  ;;  %v314_v41 = vmul.f32 %v305_v35, %v286_v36 }
  0xac   : > { %v348_v39 = vpack.c.bf16 %v345_v38, %v344_v37 }
  0xad   : > { %v338_v42 = vpop.permute.xlu1 %337  ;;  %v333_v43 = vpop.permute.xlu0 %332 }
  0xae   : > { %v343_v44 = vadd.f32 %v338_v42, %v315_v40  ;;  %v342_v45 = vadd.f32 %v333_v43, %v314_v41  ;;  %762 = vmatprep.subr.bf16.mxu0 %v348_v39  ;;  %774 = vmatprep.subr.bf16.mxu1 %v348_v39 }
  0xaf   : > { %763 = vmatpush3.bf16.msra.mxu0 %v348_v39  ;;  %776 = vmatpush3.bf16.msra.mxu1 %v348_v39 }
  0xb0   : > { %v347_v46 = vmax.f32 %v343_v44, 0.0  ;;  %v346_v47 = vmax.f32 %v342_v45, 0.0 }
  0xb1   : > { %v374_v51 = vpop.permute.xlu1 %373  ;;  %v369_v52 = vpop.permute.xlu0 %368 }
  0xb2   : > { %v349_v48 = vpack.c.bf16 %v347_v46, %v346_v47 }
  0xb4   : > { %764 = vmatprep.subr.bf16.mxu0 %v349_v48  ;;  %775 = vmatprep.subr.bf16.mxu1 %v349_v48 }
  0xb5   : > { %765 = vmatpush3.bf16.msra.mxu0 %v349_v48  ;;  %777 = vmatpush3.bf16.msra.mxu1 %v349_v48  ;;  %v384_v53 = vpop.permute.xlu1 %383  ;;  %v379_v54 = vpop.permute.xlu0 %378 }
  0xb8   : > { %767 = vmatmul.mubr.msk.bf16.vlgmr.msra.gmra.mrb[0].mxu0 %vm426_vm0, %v839_v49  ;;  %771 = vmatmul.mubr.msk.bf16.vlgmr.msra.gmra.mrb[0].mxu1 %vm426_vm0, %v840_v50 }
  0xb9   : > { %v394_v55 = vpop.permute.xlu1 %393  ;;  %v389_v56 = vpop.permute.xlu0 %388 }
  0xbd   : > { %v404_v57 = vpop.permute.xlu1 %403  ;;  %v399_v58 = vpop.permute.xlu0 %398 }
 0x18b   : > { %v768_v59 = vpop.f32.mrb[0].mxu0  ;;  %v772_v60 = vpop.f32.mrb[0].mxu1 }
 0x18c   : > { %v473_v61 = vpop.f32.mrb[1].mxu0  ;;  %v489_v62 = vpop.f32.mrb[1].mxu1  ;;  %v482_v1 = vadd.f32 %v768_v59, %v379_v54  ;;  %v498_v2 = vadd.f32 %v772_v60, %v399_v58 }
 0x18d   : > { %v769_v63 = vpop.f32.mrb[2].mxu0  ;;  %v773_v0 = vpop.f32.mrb[2].mxu1  ;;  %v474_v7 = vadd.f32 %v473_v61, %v369_v52  ;;  %v490_v8 = vadd.f32 %v489_v62, %v389_v56  ;;  %550 = sbr.rel (!%p976_p6) target bundleno = 416 (0x1a0), region = 82 }
 0x18e   : > { %v485_v3 = vadd.f32 %v769_v63, %v384_v53  ;;  %v501_v4 = vadd.f32 %v773_v0, %v404_v57  ;;  %v476_v5 = vpop.f32.mrb[3].mxu0  ;;  %v492_v6 = vpop.f32.mrb[3].mxu1 }
 0x18f   : > { %v477_v9 = vadd.f32 %v476_v5, %v374_v51  ;;  %v493_v10 = vadd.f32 %v492_v6, %v394_v55 }
 0x190   : > { %v741_v11 = vpack.c.bf16 %v485_v3, %v482_v1  ;;  %v751_v12 = vpack.c.bf16 %v501_v4, %v498_v2 }
 0x191   : > { %v736_v13 = vpack.c.bf16 %v477_v9, %v474_v7  ;;  %v746_v14 = vpack.c.bf16 %v493_v10, %v490_v8 }
 0x192   : > { %753 = vst [vmem:[%s282_s27 + $0x8] sm:$0xff] %v741_v11   ;;  %755 = vst [vmem:[%s282_s27 + $0x18] sm:$0xff] %v751_v12  }
 0x193   : > { %737 = vst [vmem:[%s282_s27] sm:$0xff] %v736_v13   ;;  %754 = vst [vmem:[%s282_s27 + $0x10] sm:$0xff] %v746_v14  }
 0x199   : > { %v574_v17 = vld [vmem:[%s282_s27 + $0x8] sm:$0xf]  ;;  %v576_v18 = vld [vmem:[%s282_s27 + $0xc] sm:$0xf]  ;;  %v582_v21 = vld [vmem:[%s282_s27 + $0x18] sm:$0xf] }
 0x19a   : > { %v570_v15 = vld [vmem:[%s282_s27] sm:$0xf]  ;;  %v572_v16 = vld [vmem:[%s282_s27 + $0x4] sm:$0xf]  ;;  %v578_v19 = vld [vmem:[%s282_s27 + $0x10] sm:$0xf] }
 0x19b   : > { %v580_v20 = vld [vmem:[%s282_s27 + $0x14] sm:$0xf]  ;;  %v584_v22 = vld [vmem:[%s282_s27 + $0x1c] sm:$0xf]  ;;  %571 = vst [vmem:[%s554_s10] sm:$0xf] %v570_v15 }
 0x19c   : > { %573 = vst [vmem:[%s554_s10 + $0x8] sm:$0xf] %v572_v16  ;;  %575 = vst [vmem:[%s554_s10 + $0x10] sm:$0xf] %v574_v17 }
 0x19d   : > { %577 = vst [vmem:[%s554_s10 + $0x18] sm:$0xf] %v576_v18  ;;  %579 = vst [vmem:[%s554_s10 + $0x20] sm:$0xf] %v578_v19 }
 0x19e   : > { %581 = vst [vmem:[%s554_s10 + $0x28] sm:$0xf] %v580_v20  ;;  %583 = vst [vmem:[%s554_s10 + $0x30] sm:$0xf] %v582_v21 }
 0x19f   : > { %585 = vst [vmem:[%s554_s10 + $0x38] sm:$0xf] %v584_v22 }
 0x1a0 PF: > { %s15_s24 = sadd.s32 1, %s895_s24   ;;  %s1099_s18 = smov %s875_s19 }
 0x1a1   : > { %p12_p12 = scmp.ge.s32.totalorder %s15_s24, 6   ;;  %s1100_s19 = smov %s984_s8 }
 0x1a2   : > { %s1101_s20 = smov %s887_s22  ;;  %s1102_s21 = smov %s891_s23 }
 0x1a3   : > { %s1103_s22 = smov %s1106_s25  ;;  %s1104_s23 = smov %s1110_s26 }
 0x1a4   :  { %14 = sbr.rel (!%p12_p12) target bundleno = 4 (0x4), region = 154 }

// kernel: spp_forward.3
= control target key start
LH: loop header
LB: loop body
LE: loop exit
PB: predicated region body
PF: predicated region fallthrough
CT: control target
= control target key end

     0   :  { %s2732_s0 = inlined_call_operand.vmem [shape: bf16[2,64,256], index: 0, kind: input, shape index: {}]   ;;  %s2733_s1 = inlined_call_operand.vmem [shape: f32[64,1], index: 1, kind: input, shape index: {}]   ;;  %s2734_s2 = inlined_call_operand.vmem [shape: f32[64,1], index: 2, kind: input, shape index: {}]   ;;  %s2735_s3 = inlined_call_operand.vmem [shape: bf16[2,16,64], index: 3, kind: input, shape index: {}]   ;;  %s2736_s4 = inlined_call_operand.vmem [shape: bf16[64,256], index: 4, kind: input, shape index: {}]   ;;  %s2737_s5 = inlined_call_operand.vmem [shape: f32[16,1], index: 5, kind: input, shape index: {}]   ;;  %s2738_s6 = inlined_call_operand.vmem [shape: f32[16,1], index: 6, kind: input, shape index: {}]   ;;  %s2739_s7 = inlined_call_operand.vmem [shape: bf16[2,16,16], index: 7, kind: input, shape index: {}]   ;;  %s2740_s8 = inlined_call_operand.vmem [shape: bf16[16,256], index: 8, kind: input, shape index: {}]   ;;  %s2741_s9 = inlined_call_operand.vmem [shape: f32[16,1], index: 9, kind: input, shape index: {}]   ;;  %s2742_s10 = inlined_call_operand.vmem [shape: f32[16,1], index: 10, kind: input, shape index: {}]   ;;  %s2743_s11 = inlined_call_operand.vmem [shape: bf16[2,16,4], index: 11, kind: input, shape index: {}]   ;;  %s2744_s12 = inlined_call_operand.vmem [shape: bf16[4,256], index: 12, kind: input, shape index: {}]   ;;  %s2745_s13 = inlined_call_operand.vmem [shape: f32[16,1], index: 13, kind: input, shape index: {}]   ;;  %s2746_s14 = inlined_call_operand.vmem [shape: f32[16,1], index: 14, kind: input, shape index: {}]   ;;  %s2747_s15 = inlined_call_operand.vmem [shape: bf16[2,16,1], index: 15, kind: input, shape index: {}]   ;;  %s2748_s16 = inlined_call_operand.vmem [shape: bf16[1,256], index: 16, kind: input, shape index: {}]   ;;  %s2749_s17 = inlined_call_operand.vmem [shape: f32[16,1], index: 17, kind: input, shape index: {}]   ;;  %s2750_s18 = inlined_call_operand.vmem [shape: f32[16,1], index: 18, kind: input, shape index: {}]   ;;  %s2751_s19 = inlined_call_operand.vmem [shape: bf16[64,128], index: 19, kind: input, shape index: {}]   ;;  %s2752_s20 = inlined_call_operand.vmem [shape: f32[64,1], index: 20, kind: input, shape index: {}]   ;;  %s2753_s21 = inlined_call_operand.vmem [shape: f32[2,64,256], index: 21, kind: output, shape index: {}]  }
   0x1   :  { %2768 = sst [smem:[#allocation16_spill]] %s2732_s0 }
   0x2   :  { %2769 = sst [smem:[#allocation17_spill]] %s2733_s1 }
   0x3   :  { %2770 = sst [smem:[#allocation18_spill]] %s2734_s2 }
   0x4   :  { %2771 = sst [smem:[#allocation19_spill]] %s2735_s3 }
   0x5   :  { %2772 = sst [smem:[#allocation20_spill]] %s2736_s4 }
   0x6   :  { %2773 = sst [smem:[#allocation21_spill]] %s2737_s5 }
   0x7   :  { %2774 = sst [smem:[#allocation22_spill]] %s2740_s8 }
   0x8   :  { %2775 = sst [smem:[#allocation23_spill]] %s2744_s12 }
   0x9   :  { %2776 = sst [smem:[#allocation24_spill]] %s2748_s16 }
   0xa   :  { %2777 = sst [smem:[#allocation25_spill]] %s2751_s19 }
   0xb   :  { %2778 = sst [smem:[#allocation26_spill]] %s2752_s20 }
   0xc   :  { %2779 = sst [smem:[#allocation27_spill]] %s2753_s21 }
   0xd   :  { %s2348_s2 = smov 0   ;;  %s2350_s25 = smov 0  }
   0xe   :  { %s2352_s26 = smov 0   ;;  %s2354_s27 = smov 0  }
   0xf   :  { %s2356_s3 = smov 0   ;;  %s2358_s28 = smov 0  }
  0x10   :  { %s2360_s29 = smov 0   ;;  %s2362_s0 = smov 0  }
  0x11   :  { %s2364_s4 = smov 0  }
  0x12 LB: > { %2780 = sst [smem:[#allocation6_spill]] %s2206_s26  ;;  %s1905_s30 = sadd.s32 4294967295, %s2230_s4   ;;  %s2230_s4 = sphi %s2364_s4, %s31_s4   ;;  %s2226_s0 = sphi %s2362_s0, %s2816_s0   ;;  %s2222_s29 = sphi %s2360_s29, %s2815_s29   ;;  %s2218_s28 = sphi %s2358_s28, %s2819_s28   ;;  %s2214_s3 = sphi %s2356_s3, %s2813_s3   ;;  %s2210_s27 = sphi %s2354_s27, %s2812_s27   ;;  %s2206_s26 = sphi %s2352_s26, %s2811_s26   ;;  %s2202_s25 = sphi %s2350_s25, %s2818_s25   ;;  %s2198_s2 = sphi %s2348_s2, %s2817_s2  }
  0x13   : > { %2781 = sst [smem:[#allocation7_spill]] %s2210_s27  ;;  %s40_s5 = sadd.s32 1, %s2222_s29 }
  0x14   : > { %2782 = sst [smem:[#allocation8_spill]] %s2214_s3  ;;  %p41_p0 = scmp.ge.s32.totalorder %s40_s5, 2 }
  0x15   : > { %2783 = sst [smem:[#allocation9_spill]] %s2222_s29  ;;  %s43_s22 = sadd.s32 1, %s2226_s0 }
  0x16   : > { %2784 = sst [smem:[#allocation10_spill]] %s2226_s0  ;;  %s52_s23 = sadd.s32 1, %s2210_s27 }
  0x17   : > { %p59_p1 = scmp.ne.s32.totalorder %s2210_s27, %s2206_s26  ;;  %s2821_s5 = smov (%p41_p0, %s40_s5), 0 }
  0x18   : > { %2785 = sst [smem:[#allocation11_spill]] %s2821_s5  ;;  %s2823_s22 = smov (!%p41_p0, %s43_s22), %s2226_s0 }
  0x19   : > { %s48_s1 = ssub.s32 %s2222_s29, %s2821_s5  ;;  %p60_p2 = scmp.eq.s32.totalorder %s2230_s4, 0 }
  0x1a   : > { %p45_p3 = scmp.ge.s32.totalorder %s2823_s22, 2  ;;  %p144_p4 = scmp.eq.s32.totalorder %s48_s1, 0 }
  0x1b   : > { %p2408_p5 = por %p60_p2, %p59_p1  ;;  %s146_s21 = sadd.s32 1, %s2202_s25 }
  0x1c   : > { %s2825_s22 = smov (%p45_p3, %s2823_s22), 0  ;;  %p153_p6 = scmp.ne.s32.totalorder %s2202_s25, %s2198_s2 }
  0x1d   : > { %2787 = sst [smem:[#allocation12_spill]] %s2825_s22  ;;  %s47_s12 = ssub.s32 %s2226_s0, %s2825_s22 }
  0x1e   : > { %s2416_s16 = scalar_select %p144_p4, %s2202_s25, %s146_s21  }
  0x1f   : > { %s49_s3 = sor.u32 %s48_s1, %s47_s12  ;;  %p551_p7 = scmp.eq.s32.totalorder %s1905_s30, 3 }
  0x20   : > { %2788 = sst [smem:[#allocation13_spill]] %s2416_s16  ;;  %p50_p8 = scmp.eq.s32.totalorder %s49_s3, 0 }
  0x21   : > { %p2422_p9 = por %p153_p6, %p60_p2  ;;  %p2429_p10 = por %p551_p7, %p59_p1 }
  0x22   : > { %s2434_s20 = scalar_select %p50_p8, %s2210_s27, %s52_s23  }
  0x23   : > { %s2790_s19 = scalar_select %p2429_p10, 1, 0 }
  0x24   : > { %2792 = sst [smem:[#allocation15_spill]] %s2434_s20  ;;  %p1908_p11 = scmp.ge.s32.totalorder %s2230_s4, 4 }
  0x25   : > { %2791 = sst [smem:[#allocation14_spill]] %s2790_s19 }
  0x26   : > { %609 = sbr.rel (%p1908_p11) target bundleno = 86 (0x56), region = 64 }
  0x2d   : > { %612 = sbr.rel (!%p2408_p5) target bundleno = 60 (0x3c), region = 68  ;;  %s614_s12 = sand.u32 (%p2408_p5), 1, %s2210_s27  }
  0x2e   : > { %s1910_s21 = sshll.u32 (%p2408_p5), %s2226_s0, 4  ;;  %s1909_s3 = sshll.u32 (%p2408_p5), %s614_s12, 5 }
  0x2f   : > { %s618_s30 = sadd.s32 (%p2408_p5), %s2222_s29, %s1910_s21  ;;  %s2793_s26 = sld [smem:[#allocation16_spill]] (%p2408_p5) }
  0x30   : > { %s1911_s1 = sshll.u32 (%p2408_p5), %s618_s30, 2  ;;  %s616_s23 = scalar_lea.vmem (%p2408_p5), [#allocation2], %s1909_s3 }
  0x35   : > { %s620_s19 = scalar_lea.vmem %s2793_s26, %s1911_s1 }
  0x36   : > { %v636_v0 = vld [vmem:[%s620_s19] sm:$0xf]  ;;  %v638_v1 = vld [vmem:[%s620_s19 + $0x8] sm:$0xf]  ;;  %v640_v2 = vld [vmem:[%s620_s19 + $0x10] sm:$0xf] }
  0x37   : > { %637 = vst [vmem:[%s616_s23] sm:$0xf] %v636_v0  ;;  %639 = vst [vmem:[%s616_s23 + $0x4] sm:$0xf] %v638_v1  ;;  %v642_v3 = vld [vmem:[%s620_s19 + $0x18] sm:$0xf] }
  0x38   : > { %641 = vst [vmem:[%s616_s23 + $0x8] sm:$0xf] %v640_v2  ;;  %v644_v4 = vld [vmem:[%s620_s19 + $0x20] sm:$0xf]  ;;  %v646_v5 = vld [vmem:[%s620_s19 + $0x28] sm:$0xf] }
  0x39   : > { %643 = vst [vmem:[%s616_s23 + $0xc] sm:$0xf] %v642_v3  ;;  %645 = vst [vmem:[%s616_s23 + $0x10] sm:$0xf] %v644_v4  ;;  %v648_v6 = vld [vmem:[%s620_s19 + $0x30] sm:$0xf] }
  0x3a   : > { %647 = vst [vmem:[%s616_s23 + $0x14] sm:$0xf] %v646_v5  ;;  %v650_v7 = vld [vmem:[%s620_s19 + $0x38] sm:$0xf]  ;;  %649 = vst [vmem:[%s616_s23 + $0x18] sm:$0xf] %v648_v6 }
  0x3b   : > { %651 = vst [vmem:[%s616_s23 + $0x1c] sm:$0xf] %v650_v7 }
  0x3c PF: > { %698 = sbr.rel (!%p2422_p9) target bundleno = 75 (0x4b), region = 113  ;;  %s700_s16 = sand.u32 (%p2422_p9), 1, %s2202_s25  }
  0x3d   : > { %s1913_s26 = sshll.u32 (%p2422_p9), %s2222_s29, 2  ;;  %s1912_s22 = sshll.u32 (%p2422_p9), %s700_s16, 5 }
  0x3e   : > { %s2794_s21 = sld [smem:[#allocation20_spill]] (%p2422_p9)  ;;  %s702_s30 = scalar_lea.vmem (%p2422_p9), [#allocation3], %s1912_s22 }
  0x44   : > { %s704_s3 = scalar_lea.vmem %s2794_s21, %s1913_s26 }
  0x45   : > { %v720_v8 = vld [vmem:[%s704_s3] sm:$0xf]  ;;  %v722_v9 = vld [vmem:[%s704_s3 + $0x8] sm:$0xf]  ;;  %v724_v10 = vld [vmem:[%s704_s3 + $0x10] sm:$0xf] }
  0x46   : > { %721 = vst [vmem:[%s702_s30] sm:$0xf] %v720_v8  ;;  %723 = vst [vmem:[%s702_s30 + $0x4] sm:$0xf] %v722_v9  ;;  %v726_v11 = vld [vmem:[%s704_s3 + $0x18] sm:$0xf] }
  0x47   : > { %v728_v12 = vld [vmem:[%s704_s3 + $0x20] sm:$0xf]  ;;  %725 = vst [vmem:[%s702_s30 + $0x8] sm:$0xf] %v724_v10  ;;  %727 = vst [vmem:[%s702_s30 + $0xc] sm:$0xf] %v726_v11 }
  0x48   : > { %729 = vst [vmem:[%s702_s30 + $0x10] sm:$0xf] %v728_v12  ;;  %v730_v13 = vld [vmem:[%s704_s3 + $0x28] sm:$0xf]  ;;  %v732_v14 = vld [vmem:[%s704_s3 + $0x30] sm:$0xf] }
  0x49   : > { %v734_v15 = vld [vmem:[%s704_s3 + $0x38] sm:$0xf]  ;;  %731 = vst [vmem:[%s702_s30 + $0x14] sm:$0xf] %v730_v13  ;;  %733 = vst [vmem:[%s702_s30 + $0x18] sm:$0xf] %v732_v14 }
  0x4a   : > { %735 = vst [vmem:[%s702_s30 + $0x1c] sm:$0xf] %v734_v15 }
  0x4b PF: > { %782 = sbr.rel (!%p2422_p9) target bundleno = 86 (0x56), region = 158  ;;  %s784_s19 = sand.u32 (%p2422_p9), 1, %s2202_s25  }
  0x4c   : > { %s1915_s1 = sshll.u32 (%p2422_p9), %s2222_s29, 2  ;;  %s1914_s23 = sshll.u32 (%p2422_p9), %s784_s19, 3 }
  0x4d   : > { %s2795_s8 = sld [smem:[#allocation22_spill]] (%p2422_p9)  ;;  %s786_s24 = scalar_lea.vmem (%p2422_p9), [#allocation4], %s1914_s23 }
  0x53   : > { %s788_s22 = scalar_lea.vmem %s2795_s8, %s1915_s1 }
  0x54   : > { %v804_v16 = vld [vmem:[%s788_s22] sm:$0xf]  ;;  %v806_v17 = vld [vmem:[%s788_s22 + $0x8] sm:$0xf] }
  0x55   : > { %805 = vst [vmem:[%s786_s24] sm:$0xf] %v804_v16  ;;  %807 = vst [vmem:[%s786_s24 + $0x4] sm:$0xf] %v806_v17 }
  0x56 PF: > { %p1916_p12 = scmp.ge.s32.totalorder %s2230_s4, 1  ;;  %p862_p13 = scmp.lt.s32.totalorder %s2230_s4, 5 }
  0x58   : > { %p863_p0 = pnand %p1916_p12, %p862_p13 }
  0x59   : > { %s2796_s21 = sld [smem:[#allocation18_spill]] (!%p863_p0)  ;;  %s876_s3 = sand.u32 (!%p863_p0), 1, %s2198_s2   ;;  %v2232_v19 = vmov (!%p863_p0), 0   ;;  %v2233_v20 = vmov (!%p863_p0), 0.0   ;;  %v2234_v22 = vmov (!%p863_p0), 2   ;;  %vm2235_vm0 = vmmov (!%p863_p0), 0  }
  0x5a   : > { %866 = sbr.rel (%p863_p0) target bundleno = 585 (0x249), region = 215  ;;  %2118 = vset.pattern.permute.xlu1 (!%p863_p0), %v2232_v19  ;;  %1998 = vmatprep.subr.bf16.mxu0 (!%p863_p0), %v2233_v20  ;;  %s1918_s30 = sshll.u32 (!%p863_p0), %s876_s3, 5  ;;  %v2236_v34 = vmov (!%p863_p0), 3   ;;  %vm1183_vm1 = vcmask (!%p863_p0), 523264   ;;  %vm1274_vm2 = vcmask (!%p863_p0), 130048   ;;  %v2237_v47 = vmov (!%p863_p0), 1  }
  0x5b   : > { %p976_p1 = scmp.lt.s32.totalorder (!%p863_p0), %s2218_s28, 1  ;;  %2126 = vset.pattern.permute.xlu0 (!%p863_p0), %v2234_v22  ;;  %s878_s23 = scalar_lea.vmem (!%p863_p0), [#allocation3], %s1918_s30  ;;  %2006 = vmatprep.mubr.msk.bf16.mxu0 (!%p863_p0), %vm2235_vm0, %v2233_v20  ;;  %v1243_v49 = vld [vmem:[%s2738_s6 + $0x8] sm:$0xff] (!%p863_p0)  ;;  %v1319_v51 = vld [vmem:[%s2741_s9] sm:$0xff] (!%p863_p0) }
  0x5c   : > { %v2149_v23 = vld [vmem:[%s878_s23] sm:$0xff] (!%p863_p0)   ;;  %s2472_s2 = sshll.u32 (!%p863_p0), %s876_s3, 3  ;;  %v2150_v24 = vld [vmem:[%s878_s23 + $0x8] sm:$0xff] (!%p863_p0)   ;;  %s2797_s5 = sld [smem:[#allocation17_spill]] (!%p863_p0)  ;;  %v2151_v29 = vld [vmem:[%s878_s23 + $0x10] sm:$0xff] (!%p863_p0)  }
  0x5d   : > { %1999 = vmatpush3.bf16.msra.mxu0 (!%p863_p0), %v2149_v23  ;;  %s2798_s8 = sld [smem:[#allocation19_spill]] (!%p863_p0)  ;;  %v2152_v32 = vld [vmem:[%s878_s23 + $0x18] sm:$0xff] (!%p863_p0)   ;;  %s2799_s29 = sld [smem:[#allocation21_spill]] (!%p863_p0)  ;;  %v1320_v53 = vld [vmem:[%s2741_s9 + $0x8] sm:$0xff] (!%p863_p0)  ;;  %v1333_v55 = vld [vmem:[%s2742_s10] sm:$0xff] (!%p863_p0) }
  0x5e   : > { %2000 = vmatprep.subr.bf16.mxu0 (!%p863_p0), %v2233_v20  ;;  %v1334_v56 = vld [vmem:[%s2742_s10 + $0x8] sm:$0xff] (!%p863_p0)  ;;  %v1242_v57 = vld [vmem:[%s2738_s6] sm:$0xff] (!%p863_p0)  ;;  %s2801_s12 = sld [smem:[#allocation26_spill]] (!%p863_p0)  ;;  %s2805_s20 = sld [smem:[#allocation23_spill]] (!%p863_p0) }
  0x5f   : > { %v1076_v18 = vld [vmem:[%s2796_s21] sm:$0xff] (!%p863_p0)  ;;  %v1077_v21 = vld [vmem:[%s2796_s21 + $0x8] sm:$0xff] (!%p863_p0)  ;;  %v1079_v31 = vld [vmem:[%s2796_s21 + $0x18] sm:$0xff] (!%p863_p0)  ;;  %s2806_s30 = sld [smem:[#allocation24_spill]] (!%p863_p0) }
  0x60   : > { %1086 = vperm.xlu1 (!%p863_p0), %2118, %v1076_v18   ;;  %v1081_v38 = vld [vmem:[%s2796_s21 + $0x28] sm:$0xff] (!%p863_p0)  ;;  %v1083_v43 = vld [vmem:[%s2796_s21 + $0x38] sm:$0xff] (!%p863_p0)  ;;  %v1078_v44 = vld [vmem:[%s2796_s21 + $0x10] sm:$0xff] (!%p863_p0) }
  0x61   : > { %s977_s16 = scalar_select %p976_p1, %s2218_s28, 1  ;;  %2001 = vmatpush3.bf16.msra.mxu0 %v2150_v24  ;;  %v1080_v48 = vld [vmem:[%s2796_s21 + $0x20] sm:$0xff]  ;;  %v1082_v52 = vld [vmem:[%s2796_s21 + $0x30] sm:$0xff]  ;;  %v1421_v58 = vld [vmem:[%s2745_s13 + $0x8] sm:$0xff] }
  0x62   : > { %v1023_v25 = vld [vmem:[%s2797_s5 + $0x18] sm:$0xff]  ;;  %2002 = vmatprep.subr.bf16.mxu0 %v2233_v20  ;;  %v1025_v33 = vld [vmem:[%s2797_s5 + $0x28] sm:$0xff]  ;;  %v1020_v37 = vld [vmem:[%s2797_s5] sm:$0xff] }
  0x63   : > { %s2474_s26 = sshll.u32 %s977_s16, 3  ;;  %s885_s16 = scalar_lea.vmem [#allocation4], %s2472_s2  ;;  %v1021_v39 = vld [vmem:[%s2797_s5 + $0x8] sm:$0xff]  ;;  %v1027_v40 = vld [vmem:[%s2797_s5 + $0x38] sm:$0xff]  ;;  %v1022_v42 = vld [vmem:[%s2797_s5 + $0x10] sm:$0xff] }
  0x64   : > { %1091 = vperm.xlu1 %2118, %v1077_v21   ;;  %s990_s19 = scalar_lea.vmem %s2743_s11, %s2474_s26  ;;  %s980_s0 = scalar_lea.vmem %s2798_s8, %s2474_s26  ;;  %v2154_v36 = vld [vmem:[%s885_s16] sm:$0xff]   ;;  %v1026_v50 = vld [vmem:[%s2797_s5 + $0x30] sm:$0xff]  ;;  %v1515_v9 = vld [vmem:[%s2801_s12 + $0x18] sm:$0xff] }
  0x65   : > { %v1969_v26 = vld [vmem:[%s990_s19] sm:$0xff]   ;;  %s985_s27 = scalar_lea.vmem %s2739_s7, %s2474_s26  ;;  %2003 = vmatpush3.bf16.msra.mxu0 %v2151_v29  ;;  %s2800_s23 = smov %s2799_s29  ;;  %v1229_v45 = vld [vmem:[%s2799_s29 + $0x8] sm:$0xff]  ;;  %v1514_v8 = vld [vmem:[%s2801_s12 + $0x10] sm:$0xff] }
  0x66   : > { %v1970_v27 = vunpack.c.l.bf16 %v1969_v26  ;;  %v1971_v28 = vunpack.c.h.bf16 %v1969_v26  ;;  %2004 = vmatprep.subr.bf16.mxu0 %v2233_v20  ;;  %v2153_v35 = vld [vmem:[%s980_s0] sm:$0xff]   ;;  %s999_s24 = scalar_lea.vmem %s2747_s15, %s2474_s26  ;;  %v1435_v0 = vld [vmem:[%s2746_s14 + $0x8] sm:$0xff]  ;;  %s2802_s16 = sld [smem:[#allocation6_spill]]  ;;  %v1518_v12 = vld [vmem:[%s2801_s12 + $0x30] sm:$0xff] }
  0x67   : > { %v2155_v41 = vld [vmem:[%s985_s27] sm:$0xff]   ;;  %v1474_v3 = vld [vmem:[%s2749_s17 + $0x8] sm:$0xff]  ;;  %v1519_v13 = vld [vmem:[%s2801_s12 + $0x38] sm:$0xff]  ;;  %s2803_s19 = sld [smem:[#allocation25_spill]]  ;;  %s1944_s26 = sshll.u32 (%p2429_p10), %s2218_s28, 4 }
  0x68   : > { %1045 = vperm.xlu1 %2118, %v1023_v25   ;;  %v2492_v30 = vpack.i.bf16 %v1971_v28, %v1970_v27  ;;  %v1024_v46 = vld [vmem:[%s2797_s5 + $0x20] sm:$0xff]  ;;  %v1488_v5 = vld [vmem:[%s2750_s18 + $0x8] sm:$0xff] }
  0x69   : > { %2005 = vmatpush3.bf16.msra.mxu0 %v2152_v32  ;;  %v1228_v54 = vld [vmem:[%s2800_s23] sm:$0xff]  ;;  %v1513_v7 = vld [vmem:[%s2801_s12 + $0x8] sm:$0xff] }
  0x6a   : > { %2128 = vperm.xlu0 %2126, %v2492_v30   ;;  %2010 = vmatprep.subr.bf16.mxu0 %v2233_v20  ;;  %v1973_v59 = vld [vmem:[%s999_s24] sm:$0xff]   ;;  %v1517_v11 = vld [vmem:[%s2801_s12 + $0x28] sm:$0xff]  ;;  %s2804_s24 = sld [smem:[#allocation8_spill]] }
  0x6b   : > { %v1420_v60 = vld [vmem:[%s2745_s13] sm:$0xff]  ;;  %v1974_v61 = vunpack.c.l.bf16 %v1973_v59  ;;  %v1975_v62 = vunpack.c.h.bf16 %v1973_v59 }
  0x6c   : > { %1101 = vperm.xlu1 %2118, %v1079_v31   ;;  %2007 = vmatmul.mubr.msk.bf16.vlgmr.msra.gmra.mrb[0].mxu0 %vm1183_vm1, %v2153_v35  ;;  %v1434_v63 = vld [vmem:[%s2746_s14] sm:$0xff]  ;;  %s869_s3 = sand.u32 1, %s2802_s16  }
  0x6d   : > { %2011 = vmatpush3.bf16.msra.mxu0 %v2154_v36  ;;  %2012 = vmatprep.mubr.msk.bf16.mxu0 %vm2235_vm0, %v2233_v20  ;;  %v2144_v1 = vpack.i.bf16 %v1975_v62, %v1974_v61  ;;  %v1473_v2 = vld [vmem:[%s2749_s17] sm:$0xff]  ;;  %s1917_s1 = sshll.u32 %s869_s3, 5  ;;  %v1366_v61 = vlaneseq }
  0x6e   : > { %2132 = vset.pattern.permute.xlu0 %v2236_v34  ;;  %v1487_v4 = vld [vmem:[%s2750_s18] sm:$0xff]  ;;  %s2624_s22 = scalar_lea.vmem [#allocation2], %s1917_s1 }
  0x6f   : > { %2134 = vperm.xlu0 %2132, %v2492_v30   ;;  %v1512_v6 = vld [vmem:[%s2801_s12] sm:$0xff]  ;;  %v1976_v24 = vld [vmem:[%s2624_s22 + $0x8] sm:$0xff]   ;;  %v1977_v36 = vld [vmem:[%s2624_s22 + $0x10] sm:$0xff]  }
  0x70   : > { %1055 = vperm.xlu1 %2118, %v1025_v33   ;;  %v1516_v10 = vld [vmem:[%s2801_s12 + $0x20] sm:$0xff]  ;;  %v1959_v27 = vunpack.c.h.bf16 %v1976_v24  ;;  %v1958_v35 = vunpack.c.l.bf16 %v1976_v24  ;;  %p991_p2 = scmp.lt.s32.totalorder %s2804_s24, 1 }
  0x71   : > { %v2156_v15 = vld [vmem:[%s2803_s19] sm:$0xff]  }
  0x72   : > { %2032 = vmatprep.mubr.bf16.mxu1 %v2156_v15  ;;  %v1953_v20 = vld [vmem:[%s2624_s22] sm:$0xff]   ;;  %s2827_s24 = smov (!%p991_p2, %s2804_s24), 1 }
  0x73   : > { %2138 = vset.pattern.permute.xlu0 %v2232_v19  ;;  %v1954_v23 = vunpack.c.l.bf16 %v1953_v20  ;;  %v1955_v29 = vunpack.c.h.bf16 %v1953_v20  ;;  %s1927_s8 = sshll.u32 %s2827_s24, 1  ;;  %s1002_s1 = scalar_lea.vmem %s2806_s30, %s2827_s24 }
  0x74   : > { %1030 = vperm.xlu0 %2138, %v1020_v37   ;;  %1111 = vperm.xlu1 %2118, %v1081_v38   ;;  %s994_s29 = scalar_lea.vmem %s2805_s20, %s1927_s8  ;;  %s2809_s8 = sld [smem:[#allocation27_spill]] (%p2429_p10) }
  0x75   : > { %2013 = vmatmul.mubr.msk.bf16.vlgmr.msra.gmra.mrb[4].mxu0 %vm1274_vm2, %v2155_v41 }
  0x78   : > { %1035 = vperm.xlu0 %2138, %v1021_v39   ;;  %1065 = vperm.xlu1 %2118, %v1027_v40  }
  0x7c   : > { %1040 = vperm.xlu0 %2138, %v1022_v42   ;;  %1121 = vperm.xlu1 %2118, %v1083_v43   ;;  %v1963_v42 = vunpack.c.h.bf16 %v1977_v36 }
  0x80   : > { %1096 = vperm.xlu0 %2138, %v1078_v44   ;;  %1237 = vperm.xlu1 %2118, %v1229_v45  }
  0x84   : > { %1050 = vperm.xlu0 %2138, %v1024_v46   ;;  %2119 = vset.pattern.permute.xlu1 %v2237_v47 }
  0x85   : > { %2121 = vperm.xlu1 %2119, %v2492_v30  }
  0x88   : > { %1106 = vperm.xlu0 %2138, %v1080_v48  }
  0x89   : > { %2125 = vset.pattern.permute.xlu1 %v2232_v19 }
  0x8a   : > { %1251 = vperm.xlu1 %2125, %v1243_v49  }
  0x8c   : > { %1060 = vperm.xlu0 %2138, %v1026_v50  }
  0x8e   : > { %1323 = vperm.xlu1 %2125, %v1319_v51   ;;  %v1962_v51 = vunpack.c.l.bf16 %v1977_v36 }
  0x90   : > { %1116 = vperm.xlu0 %2138, %v1082_v52  }
  0x92   : > { %1328 = vperm.xlu1 %2125, %v1320_v53   ;;  %v1978_v53 = vld [vmem:[%s2624_s22 + $0x18] sm:$0xff]  }
  0x93   : > { %v1967_v59 = vunpack.c.h.bf16 %v1978_v53 }
  0x94   : > { %1232 = vperm.xlu0 %2138, %v1228_v54  }
  0x96   : > { %1337 = vperm.xlu1 %2125, %v1333_v55  }
  0x98   : > { %2140 = vperm.xlu0 %2138, %v2492_v30  }
  0x9a   : > { %1342 = vperm.xlu1 %2125, %v1334_v56  }
  0x9c   : > { %1246 = vperm.xlu0 %2138, %v1242_v57  }
  0x9e   : > { %1429 = vperm.xlu1 %2125, %v1421_v58  }
  0xa0   : > { %1424 = vperm.xlu0 %2138, %v1420_v60  }
  0xa2   : > { %1438 = vperm.xlu1 %2125, %v1434_v63  }
  0xa4   : > { %1443 = vperm.xlu0 %2138, %v1435_v0   ;;  %v1966_v0 = vunpack.c.l.bf16 %v1978_v53 }
  0xa6   : > { %2145 = vperm.xlu1 %2125, %v2144_v1  }
  0xa8   : > { %1477 = vperm.xlu0 %2138, %v1473_v2  }
  0xaa   : > { %1482 = vperm.xlu1 %2125, %v1474_v3  }
  0xac   : > { %1491 = vperm.xlu0 %2138, %v1487_v4  }
  0xae   : > { %1496 = vperm.xlu1 %2125, %v1488_v5   ;;  %v2644_v5 = vshrl.u32 %v1366_v61, 7 }
  0xb0   : > { %1522 = vperm.xlu0 %2138, %v1512_v6   ;;  %v1368_v20 = vsub.s32 0, %v2644_v5 }
  0xb2   : > { %1527 = vperm.xlu1 %2125, %v1513_v7  }
  0xb4   : > { %1532 = vperm.xlu0 %2138, %v1514_v8   ;;  %v1354_v8 = vld [vmem:[%s994_s29] sm:$0x3]  ;;  %s1920_s29 = sshll.u32 %s869_s3, 6  ;;  %s2808_s3 = sld [smem:[#allocation8_spill]] (%p2429_p10) }
  0xb5   : > { %s2680_s0 = scalar_lea.vmem [#allocation5], %s1920_s29 }
  0xb6   : > { %1537 = vperm.xlu1 %2125, %v1515_v9  }
  0xb8   : > { %1542 = vperm.xlu0 %2138, %v1516_v10  }
  0xba   : > { %1547 = vperm.xlu1 %2125, %v1517_v11   ;;  %s1665_s30 = sadd.s32 (%p2429_p10), %s2808_s3, %s1944_s26 }
  0xbc   : > { %1552 = vperm.xlu0 %2138, %v1518_v12   ;;  %v1355_v12 = vunpack.c.l.bf16 %v1354_v8 }
  0xbe   : > { %1557 = vperm.xlu1 %2125, %v1519_v13   ;;  %v1382_v13 = vsub.s32 1, %v2644_v5 }
  0xc0   : > { %v1383_v24 = vrot.slane %v1355_v12, %v1382_v13 }
  0xdf   : > { %v1087_v14 = vpop.permute.xlu1 %1086 }
  0xe3   : > { %v1092_v16 = vpop.permute.xlu1 %1091 }
  0xe7   : > { %v1046_v17 = vpop.permute.xlu1 %1045 }
  0xe8   : > { %v1071_v33 = vmul.f32 %v1959_v27, %v1046_v17 }
  0xe9   : > { %v2622_v18 = vpop.permute.xlu0 %2128 }
  0xeb   : > { %v1102_v19 = vpop.permute.xlu1 %1101 }
  0xec   : > { %v1127_v41 = vadd.f32 %v1102_v19, %v1071_v33 }
  0xee   : > { %v2627_v21 = vpop.permute.xlu0 %2134  ;;  %v1135_v48 = vmax.f32 %v1127_v41, 0.0 }
  0xef   : > { %v1056_v22 = vpop.permute.xlu1 %1055 }
  0xf0   : > { %v1073_v49 = vmul.f32 %v1963_v42, %v1056_v22  ;;  %v1414_v22 = vsub.s32 3, %v2644_v5 }
  0xf2   : > { %v1415_v33 = vrot.slane %v1355_v12, %v1414_v22 }
  0xf3   : > { %v1031_v25 = vpop.permute.xlu0 %1030  ;;  %v1112_v26 = vpop.permute.xlu1 %1111 }
  0xf4   : > { %v1068_v28 = vmul.f32 %v1954_v23, %v1031_v25  ;;  %v1129_v55 = vadd.f32 %v1112_v26, %v1073_v49 }
  0xf6   : > { %v1124_v30 = vadd.f32 %v1087_v14, %v1068_v28  ;;  %v1137_v62 = vmax.f32 %v1129_v55, 0.0 }
  0xf7   : > { %v1036_v31 = vpop.permute.xlu0 %1035  ;;  %v1066_v32 = vpop.permute.xlu1 %1065 }
  0xf8   : > { %v1069_v34 = vmul.f32 %v1955_v29, %v1036_v31  ;;  %v1132_v37 = vmax.f32 %v1124_v30, 0.0  ;;  %v1075_v2 = vmul.f32 %v1967_v59, %v1066_v32  ;;  %v2131_v30 = vunpack.i.h.bf16 %v2622_v18 }
  0xf9   : > { %v2130_v31 = vunpack.i.l.bf16 %v2622_v18  ;;  %v1369_v32 = vrot.slane %v1355_v12, %v1368_v20 }
  0xfa   : > { %v1125_v38 = vadd.f32 %v1092_v16, %v1069_v34  ;;  %v1398_v16 = vsub.s32 2, %v2644_v5  ;;  %v2137_v34 = vunpack.i.h.bf16 %v2627_v21 }
  0xfb   : > { %v1041_v39 = vpop.permute.xlu0 %1040  ;;  %v1122_v40 = vpop.permute.xlu1 %1121 }
  0xfc   : > { %v1133_v43 = vmax.f32 %v1125_v38, 0.0  ;;  %v1070_v44 = vmul.f32 %v1958_v35, %v1041_v39  ;;  %v1131_v10 = vadd.f32 %v1122_v40, %v1075_v2  ;;  %v1399_v29 = vrot.slane %v1355_v12, %v1398_v16  ;;  %v1455_v2 = vld [vmem:[%s1002_s1] sm:$0x1]  ;;  %s1945_s1 = sshll.u32 (%p2429_p10), %s1665_s30, 3 }
  0xfd   : > { %v2136_v35 = vunpack.i.l.bf16 %v2627_v21  ;;  %v1417_v18 = vmul.f32 %v2137_v34, %v1415_v33  ;;  %v1456_v5 = vunpack.c.l.bf16 %v1455_v2  ;;  %s1667_s2 = scalar_lea.vmem (%p2429_p10), %s2809_s8, %s1945_s1 }
  0xfe   : > { %v1140_v45 = vpack.c.bf16 %v1133_v43, %v1132_v37  ;;  %v1139_v17 = vmax.f32 %v1131_v10, 0.0  ;;  %v1401_v42 = vmul.f32 %v2131_v30, %v1399_v29  ;;  %v1400_v43 = vmul.f32 %v2130_v31, %v1399_v29 }
  0xff   : > { %v1097_v46 = vpop.permute.xlu0 %1096  ;;  %v2632_v47 = vpop.permute.xlu1 %1237  ;;  %v1470_v16 = vrot.slane %v1456_v5, %v1368_v20 }
 0x100   : > { %v1126_v50 = vadd.f32 %v1097_v46, %v1070_v44  ;;  %2016 = vmatprep.subr.bf16.mxu1 %v1140_v45 }
 0x101   : > { %2017 = vmatpush3.bf16.msra.mxu1 %v1140_v45 }
 0x102   : > { %v1134_v52 = vmax.f32 %v1126_v50, 0.0 }
 0x103   : > { %v1051_v54 = vpop.permute.xlu0 %1050 }
 0x104   : > { %v1141_v56 = vpack.c.bf16 %v1135_v48, %v1134_v52  ;;  %v1072_v57 = vmul.f32 %v1962_v51, %v1051_v54  ;;  %v2122_v58 = vpop.permute.xlu1 %2121  ;;  %v1416_v48 = vmul.f32 %v2136_v35, %v1415_v33 }
 0x105   : > { %v2124_v25 = vunpack.i.h.bf16 %v2122_v58  ;;  %v2123_v26 = vunpack.i.l.bf16 %v2122_v58 }
 0x106   : > { %2018 = vmatprep.subr.bf16.mxu1 %v1141_v56 }
 0x107   : > { %v1107_v60 = vpop.permute.xlu0 %1106  ;;  %2019 = vmatpush3.bf16.msra.mxu1 %v1141_v56  ;;  %v1385_v37 = vmul.f32 %v2124_v25, %v1383_v24  ;;  %v1384_v38 = vmul.f32 %v2123_v26, %v1383_v24 }
 0x108   : > { %v1128_v63 = vadd.f32 %v1107_v60, %v1072_v57 }
 0x109   : > { %v2639_v1 = vpop.permute.xlu1 %1251 }
 0x10a   : > { %v1136_v3 = vmax.f32 %v1128_v63, 0.0 }
 0x10b   : > { %v1061_v4 = vpop.permute.xlu0 %1060 }
 0x10c   : > { %v1142_v6 = vpack.c.bf16 %v1137_v62, %v1136_v3  ;;  %v1074_v7 = vmul.f32 %v1966_v0, %v1061_v4 }
 0x10d   : > { %v2646_v9 = vpop.permute.xlu1 %1323 }
 0x10e   : > { %2020 = vmatprep.subr.bf16.mxu1 %v1142_v6 }
 0x10f   : > { %v1117_v11 = vpop.permute.xlu0 %1116  ;;  %2021 = vmatpush3.bf16.msra.mxu1 %v1142_v6 }
 0x110   : > { %v1130_v14 = vadd.f32 %v1117_v11, %v1074_v7 }
 0x111   : > { %v2649_v15 = vpop.permute.xlu1 %1328 }
 0x112   : > { %v1138_v19 = vmax.f32 %v1130_v14, 0.0 }
 0x113   : > { %v1233_v23 = vpop.permute.xlu0 %1232 }
 0x114   : > { %v1143_v27 = vpack.c.bf16 %v1139_v17, %v1138_v19 }
 0x115   : > { %v2654_v28 = vpop.permute.xlu1 %1337 }
 0x116   : > { %2022 = vmatprep.subr.bf16.mxu1 %v1143_v27 }
 0x117   : > { %v2141_v36 = vpop.permute.xlu0 %2140  ;;  %2023 = vmatpush3.bf16.msra.mxu1 %v1143_v27 }
 0x118   : > { %v2143_v39 = vunpack.i.h.bf16 %v2141_v36  ;;  %v2142_v40 = vunpack.i.l.bf16 %v2141_v36 }
 0x119   : > { %v1343_v41 = vpop.permute.xlu1 %1342 }
 0x11a   : > { %v1371_v44 = vmul.f32 %v2143_v39, %v1369_v32  ;;  %v1370_v45 = vmul.f32 %v2142_v40, %v1369_v32 }
 0x11b   : > { %v1247_v46 = vpop.permute.xlu0 %1246 }
 0x11c   : > { %v1386_v49 = vadd.f32 %v1384_v38, %v1370_v45  ;;  %v1387_v50 = vadd.f32 %v1385_v37, %v1371_v44  ;;  %v2159_v45 = vld [vmem:[%s2803_s19 + $0x18] sm:$0xff]  }
 0x11d   : > { %v1430_v51 = vpop.permute.xlu1 %1429 }
 0x11e   : > { %v1403_v52 = vadd.f32 %v1401_v42, %v1387_v50  ;;  %v1402_v21 = vadd.f32 %v1400_v43, %v1386_v49 }
 0x11f   : > { %v1425_v53 = vpop.permute.xlu0 %1424 }
 0x120   : > { %v1419_v54 = vadd.f32 %v1417_v18, %v1403_v52  ;;  %v1418_v55 = vadd.f32 %v1416_v48, %v1402_v21 }
 0x121   : > { %v1439_v56 = vpop.permute.xlu1 %1438 }
 0x122   : > { %v1433_v57 = vmul.f32 %v1430_v51, %v1419_v54  ;;  %v1432_v58 = vmul.f32 %v1425_v53, %v1418_v55 }
 0x123   : > { %v1444_v59 = vpop.permute.xlu0 %1443 }
 0x124   : > { %v1446_v60 = vadd.f32 %v1439_v56, %v1432_v58  ;;  %v1447_v61 = vadd.f32 %v1444_v59, %v1433_v57 }
 0x125   : > { %v2146_v3 = vpop.permute.xlu1 %2145 }
 0x126   : > { %v1448_v62 = vmax.f32 %v1446_v60, 0.0  ;;  %v1449_v63 = vmax.f32 %v1447_v61, 0.0  ;;  %v2148_v10 = vunpack.i.h.bf16 %v2146_v3  ;;  %v2147_v14 = vunpack.i.l.bf16 %v2146_v3 }
 0x127   : > { %v1478_v26 = vpop.permute.xlu0 %1477 }
 0x128   : > { %v1450_v0 = vpack.c.bf16 %v1449_v63, %v1448_v62  ;;  %v1472_v22 = vmul.f32 %v2148_v10, %v1470_v16  ;;  %v1471_v29 = vmul.f32 %v2147_v14, %v1470_v16 }
 0x129   : > { %v1483_v19 = vpop.permute.xlu1 %1482 }
 0x12a   : > { %v1486_v33 = vmul.f32 %v1483_v19, %v1472_v22  ;;  %v1485_v35 = vmul.f32 %v1478_v26, %v1471_v29 }
 0x12b   : > { %v1492_v37 = vpop.permute.xlu0 %1491 }
 0x12c   : > { %v1499_v42 = vadd.f32 %v1492_v37, %v1485_v35 }
 0x12e   : > { %v1501_v44 = vmax.f32 %v1499_v42, 0.0 }
 0x13f   : > { %v1221_v4 = vpop.f32.mrb[0].mxu0 }
 0x140   : > { %v1240_v6 = vmul.f32 %v1233_v23, %v1221_v4  ;;  %v2008_v7 = vpop.f32.mrb[1].mxu0 }
 0x141   : > { %v1224_v8 = vpop.f32.mrb[2].mxu0 }
 0x142   : > { %v1254_v11 = vadd.f32 %v1247_v46, %v1240_v6  ;;  %v1241_v12 = vmul.f32 %v2632_v47, %v1224_v8  ;;  %v2009_v13 = vpop.f32.mrb[3].mxu0  ;;  %v1523_v46 = vpop.permute.xlu0 %1522 }
 0x144   : > { %v1255_v17 = vadd.f32 %v2639_v1, %v1241_v12  ;;  %v1256_v24 = vmax.f32 %v1254_v11, 0.0  ;;  %v1497_v1 = vpop.permute.xlu1 %1496 }
 0x145   : > { %v1500_v38 = vadd.f32 %v1497_v1, %v1486_v33 }
 0x146   : > { %v1257_v25 = vmax.f32 %v1255_v17, 0.0  ;;  %v1533_v48 = vpop.permute.xlu0 %1532 }
 0x147   : > { %v1502_v43 = vmax.f32 %v1500_v38, 0.0 }
 0x148   : > { %v1312_v27 = vpop.f32.mrb[4].mxu0  ;;  %v1258_v31 = vpack.c.bf16 %v1257_v25, %v1256_v24  ;;  %v1528_v18 = vpop.permute.xlu1 %1527 }
 0x149   : > { %v1331_v23 = vmul.f32 %v2646_v9, %v1312_v27  ;;  %v2014_v30 = vpop.f32.mrb[5].mxu0 }
 0x14a   : > { %v1315_v32 = vpop.f32.mrb[6].mxu0  ;;  %2024 = vmatprep.subr.bf16.mxu1 %v1258_v31  ;;  %v1543_v21 = vpop.permute.xlu0 %1542 }
 0x14b   : > { %v1345_v47 = vadd.f32 %v2654_v28, %v1331_v23  ;;  %v1332_v34 = vmul.f32 %v2649_v15, %v1315_v32  ;;  %v2015_v20 = vpop.f32.mrb[7].mxu0  ;;  %2025 = vmatpush3.bf16.msra.mxu1 %v1258_v31  ;;  %v1503_v28 = vpack.c.bf16 %v1502_v43, %v1501_v44  ;;  %v2157_v15 = vld [vmem:[%s2803_s19 + $0x8] sm:$0xff]  }
 0x14c   : > { %v1538_v49 = vpop.permute.xlu1 %1537 }
 0x14d   : > { %v1346_v36 = vadd.f32 %v1343_v41, %v1332_v34  ;;  %v1347_v39 = vmax.f32 %v1345_v47, 0.0  ;;  %v2158_v41 = vld [vmem:[%s2803_s19 + $0x10] sm:$0xff]  }
 0x14e   : > { %v1553_v59 = vpop.permute.xlu0 %1552 }
 0x14f   : > { %v1348_v40 = vmax.f32 %v1346_v36, 0.0 }
 0x150   : > { %v1548_v57 = vpop.permute.xlu1 %1547 }
 0x151   : > { %v1349_v9 = vpack.c.bf16 %v1348_v40, %v1347_v39 }
 0x153   : > { %2026 = vmatprep.subr.bf16.mxu1 %v1349_v9 }
 0x154   : > { %2027 = vmatpush3.bf16.msra.mxu1 %v1349_v9  ;;  %v1558_v63 = vpop.permute.xlu1 %1557 }
 0x155   : > { %2028 = vmatprep.subr.bf16.mxu1 %v1450_v0 }
 0x158   : > { %2029 = vmatpush3.bf16.msra.mxu1 %v1450_v0 }
 0x159   : > { %2030 = vmatprep.subr.bf16.mxu1 %v1503_v28 }
 0x15c   : > { %2031 = vmatpush3.bf16.msra.mxu1 %v1503_v28 }
 0x15f   : > { %2033 = vmatmul.mubr.bf16.vlgmr.msra.gmra.mrb[0].mxu1 %v2157_v15 }
 0x160   : > { %2036 = vmatprep.mubr.bf16.mxu1 %v2158_v41 }
 0x167   : > { %2037 = vmatmul.mubr.bf16.gmra.mrb[4].mxu1 %v2159_v45 }
 0x232   : > { %v2034_v50 = vpop.f32.mrb[0].mxu1 }
 0x233   : > { %v1627_v51 = vadd.f32 %v2034_v50, %v1533_v48  ;;  %v1618_v52 = vpop.f32.mrb[1].mxu1 }
 0x234   : > { %v1619_v53 = vadd.f32 %v1618_v52, %v1523_v46  ;;  %v2035_v54 = vpop.f32.mrb[2].mxu1 }
 0x235   : > { %1651 = vst [vmem:[%s2680_s0 + $0x10] sm:$0xff] %v1627_v51  ;;  %v1630_v55 = vadd.f32 %v2035_v54, %v1538_v49  ;;  %v1621_v56 = vpop.f32.mrb[3].mxu1 }
 0x236   : > { %1649 = vst [vmem:[%s2680_s0] sm:$0xff] %v1619_v53  ;;  %v1622_v58 = vadd.f32 %v1621_v56, %v1528_v18 }
 0x237   : > { %1652 = vst [vmem:[%s2680_s0 + $0x18] sm:$0xff] %v1630_v55 }
 0x238   : > { %1650 = vst [vmem:[%s2680_s0 + $0x8] sm:$0xff] %v1622_v58 }
 0x23a   : > { %v2038_v60 = vpop.f32.mrb[4].mxu1  ;;  %1663 = sbr.rel (!%p2429_p10) target bundleno = 585 (0x249), region = 231 }
 0x23b   : > { %v1643_v61 = vadd.f32 %v2038_v60, %v1553_v59  ;;  %v1634_v62 = vpop.f32.mrb[5].mxu1 }
 0x23c   : > { %v1635_v0 = vadd.f32 %v1634_v62, %v1543_v21  ;;  %v2039_v2 = vpop.f32.mrb[6].mxu1  ;;  %v1713_v8 = vld [vmem:[%s2680_s0 + $0x10] sm:$0xff] (%p2429_p10) }
 0x23d   : > { %1655 = vst [vmem:[%s2680_s0 + $0x30] sm:$0xff] %v1643_v61  ;;  %v1646_v3 = vadd.f32 %v2039_v2, %v1558_v63  ;;  %v1637_v4 = vpop.f32.mrb[7].mxu1  ;;  %v1709_v6 = vld [vmem:[%s2680_s0] sm:$0xff] (%p2429_p10)  ;;  %1714 = vst [vmem:[%s1667_s2 + $0x20] sm:$0xff] (%p2429_p10), %v1713_v8 }
 0x23e   : > { %1653 = vst [vmem:[%s2680_s0 + $0x20] sm:$0xff] %v1635_v0  ;;  %v1638_v5 = vadd.f32 %v1637_v4, %v1548_v57  ;;  %v1715_v10 = vld [vmem:[%s2680_s0 + $0x18] sm:$0xff] (%p2429_p10)  ;;  %1710 = vst [vmem:[%s1667_s2] sm:$0xff] (%p2429_p10), %v1709_v6 }
 0x23f   : > { %1656 = vst [vmem:[%s2680_s0 + $0x38] sm:$0xff] %v1646_v3  ;;  %v1711_v7 = vld [vmem:[%s2680_s0 + $0x8] sm:$0xff] (%p2429_p10)  ;;  %1716 = vst [vmem:[%s1667_s2 + $0x30] sm:$0xff] (%p2429_p10), %v1715_v10 }
 0x240   : > { %1654 = vst [vmem:[%s2680_s0 + $0x28] sm:$0xff] %v1638_v5  ;;  %1712 = vst [vmem:[%s1667_s2 + $0x10] sm:$0xff] (%p2429_p10), %v1711_v7 }
 0x244   : > { %v1721_v13 = vld [vmem:[%s2680_s0 + $0x30] sm:$0xff] }
 0x245   : > { %v1717_v11 = vld [vmem:[%s2680_s0 + $0x20] sm:$0xff]  ;;  %1722 = vst [vmem:[%s1667_s2 + $0x60] sm:$0xff] %v1721_v13 }
 0x246   : > { %v1723_v14 = vld [vmem:[%s2680_s0 + $0x38] sm:$0xff]  ;;  %1718 = vst [vmem:[%s1667_s2 + $0x40] sm:$0xff] %v1717_v11 }
 0x247   : > { %v1719_v12 = vld [vmem:[%s2680_s0 + $0x28] sm:$0xff]  ;;  %1724 = vst [vmem:[%s1667_s2 + $0x70] sm:$0xff] %v1723_v14 }
 0x248   : > { %1720 = vst [vmem:[%s1667_s2 + $0x50] sm:$0xff] %v1719_v12 }
 0x249 PF: > { %s31_s4 = sadd.s32 1, %s2230_s4   ;;  %s2810_s28 = sld [smem:[#allocation13_spill]] }
 0x24a   : > { %p28_p3 = scmp.ge.s32.totalorder %s31_s4, 6   ;;  %s2811_s26 = sld [smem:[#allocation7_spill]] }
 0x24b   : > { %s2812_s27 = sld [smem:[#allocation15_spill]]  ;;  %s2813_s3 = sld [smem:[#allocation9_spill]] }
 0x24c   : > { %s2814_s20 = sld [smem:[#allocation10_spill]]  ;;  %s2815_s29 = sld [smem:[#allocation11_spill]] }
 0x24d   : > { %s2816_s0 = sld [smem:[#allocation12_spill]]  ;;  %s2817_s2 = smov %s2202_s25 }
 0x24e   :  { %30 = sbr.rel (!%p28_p3) target bundleno = 18 (0x12), region = 334 }
 0x24f   : > { %s2818_s25 = smov %s2810_s28 }
 0x252   : > { %s2819_s28 = smov %s2814_s20 }

</bundles_post_ra>
